<compile_context>
chip_gen: v6e
topology: v6e:2x2x1
jax: 0.10.0
libtpu: 0.0.40
codegen_flags: <defaults>
</compile_context>

<pallas_src>
import math

import jax
import jax.numpy as jnp
from jax.experimental import pallas as pl
from jax.experimental.pallas import tpu as pltpu

# ---- module hyper-parameters (fixed by MelExtractor.__init__ defaults) ----
SAMPLE_RATE = 24000
N_FFT = 1024
HOP = 256
N_MELS = 100
N_FREQS = N_FFT // 2 + 1            # 513 onesided STFT bins
FREQ_USED = N_FREQS - 1             # 512: DC bin dropped (its mel-filter row is exactly 0)
MEL_PAD = 128                       # n_mels padded to one lane-dense vreg width
CHUNKS_PER_FRAME = N_FFT // HOP     # 4 hop-chunks per frame
CLIP_VAL = 1e-7
MAX_ROW_TILE = 512                  # frames (rows) per grid step
TAIL = 8                            # extra chunk rows needed for the last 3 frames of a tile


# ---------------------------------------------------------------------------
# Parameter construction (mirrors torchaudio.functional.melscale_fbanks with
# mel_scale="htk", norm=None, f_min=0, f_max=sample_rate/2)
# ---------------------------------------------------------------------------
def _hz_to_mel(f):
    return 2595.0 * math.log10(1.0 + f / 700.0)


def mel_filterbank():
    """(FREQ_USED, MEL_PAD) filterbank; DC row (identically zero) dropped, Nyquist kept."""
    all_freqs = jnp.linspace(0.0, float(SAMPLE_RATE // 2), N_FREQS)
    m_pts = jnp.linspace(_hz_to_mel(0.0), _hz_to_mel(SAMPLE_RATE / 2.0), N_MELS + 2)
    f_pts = 700.0 * (10.0 ** (m_pts / 2595.0) - 1.0)
    f_diff = f_pts[1:] - f_pts[:-1]                       # (n_mels + 1,)
    slopes = f_pts[None, :] - all_freqs[:, None]          # (n_freqs, n_mels + 2)
    down = -slopes[:, :-2] / f_diff[:-1]
    up = slopes[:, 2:] / f_diff[1:]
    fb = jnp.maximum(0.0, jnp.minimum(down, up)).astype(jnp.float32)   # (513, 100)
    fb = fb[1:]                                                         # drop DC row (== 0)
    return jnp.pad(fb, ((0, 0), (0, MEL_PAD - N_MELS)))                 # (512, 128)


def windowed_trig_matrix():
    """[hann*cos | hann*sin] for bins 1..512 -> (N_FFT, 2*FREQ_USED), Hann folded in."""
    n = jnp.arange(N_FFT, dtype=jnp.int32)
    k = jnp.arange(1, N_FREQS, dtype=jnp.int32)           # bins 1..512 (DC dropped)
    phase = (2.0 * jnp.pi / N_FFT) * ((n[:, None] * k[None, :]) % N_FFT).astype(jnp.float32)
    nf = n.astype(jnp.float32)
    window = 0.5 - 0.5 * jnp.cos(2.0 * jnp.pi * nf / N_FFT)             # periodic Hann
    cos_m = jnp.cos(phase) * window[:, None]
    sin_m = jnp.sin(phase) * window[:, None]
    return jnp.concatenate([cos_m, sin_m], axis=1)                      # (1024, 1024) f32


# ---------------------------------------------------------------------------
# Kernel: for a tile of row_tile frames (frame f = hop-chunks f..f+3):
#   [re|im](f) = sum_j chunk(f+j) @ (hann*[cos|sin])[j*HOP:(j+1)*HOP]   (4 bf16 MXU matmuls)
#   mag = sqrt(re^2 + im^2)                                             (power=1 magnitude)
#   mel = mag @ fbank                                                   (bf16 MXU matmul)
#   out = log(max(mel, 1e-7))                                           (safe_log)
# ---------------------------------------------------------------------------
def mel_kernel(main_ref, tail_ref, trig_ref, fb_ref, out_ref):
    rt = main_ref.shape[0]
    main = main_ref[...]                                                # (rt, HOP) bf16
    # strip of rt+8 chunk rows; shifted slices are done in f32 (cheap, robust relayout)
    strip = jnp.concatenate(
        [main.astype(jnp.float32), tail_ref[...].astype(jnp.float32)], axis=0)

    ri = jnp.dot(main, trig_ref[pl.ds(0, HOP), :],
                 preferred_element_type=jnp.float32)                    # j = 0 (aligned)
    for j in range(1, CHUNKS_PER_FRAME):                                # j = 1..3 (shifted)
        lhs = strip[j:j + rt, :].astype(jnp.bfloat16)
        ri = ri + jnp.dot(lhs, trig_ref[pl.ds(j * HOP, HOP), :],
                          preferred_element_type=jnp.float32)           # (rt, 2*FREQ_USED)

    re = ri[:, :FREQ_USED]
    im = ri[:, FREQ_USED:]
    mag = jnp.sqrt(re * re + im * im)                                   # (rt, 512) f32
    mel = jnp.dot(mag.astype(jnp.bfloat16), fb_ref[...],
                  preferred_element_type=jnp.float32)                   # (rt, MEL_PAD) f32
    out_ref[...] = jnp.log(jnp.maximum(mel, jnp.float32(CLIP_VAL)))     # safe_log


# ---------------------------------------------------------------------------
# Host wrapper
# ---------------------------------------------------------------------------
def _round_up(x, m):
    return ((x + m - 1) // m) * m


def _pick_row_tile(n_frames, batch):
    rt = min(MAX_ROW_TILE, _round_up(n_frames, 8))
    # ensure the grid has >= 2 steps when possible so both v7x TensorCores get work
    if batch * ((n_frames + rt - 1) // rt) < 2 and n_frames > 8:
        rt = _round_up((n_frames + 1) // 2, 8)
    return rt


def mel_extractor(audio):
    """audio: (B, T) float -> (B, N_MELS, T // HOP + 1) float32 (padding='center')."""
    B, T = audio.shape
    pad = N_FFT // 2

    padded = jnp.pad(audio.astype(jnp.float32), ((0, 0), (pad, pad)), mode="reflect")
    n_frames = (padded.shape[1] - N_FFT) // HOP + 1                     # == T // HOP + 1

    row_tile = _pick_row_tile(n_frames, B)                              # multiple of 8
    n_tiles = (n_frames + row_tile - 1) // row_tile
    n_chunks = n_tiles * row_tile + TAIL                                # covers the last strip

    # hop-sized chunk rows: pure pad + reshape (no gather, no frame duplication in HBM)
    padded = jnp.pad(padded, ((0, 0), (0, n_chunks * HOP - padded.shape[1])))
    chunks = padded.reshape(B, n_chunks, HOP).astype(jnp.bfloat16)      # (B, n_chunks, 256)

    trig = windowed_trig_matrix().astype(jnp.bfloat16)                  # (1024, 1024)
    fb = mel_filterbank().astype(jnp.bfloat16)                          # (512, 128)

    tail_blk = row_tile // TAIL                                         # tail block-index scale

    out = pl.pallas_call(
        mel_kernel,
        out_shape=jax.ShapeDtypeStruct((B, n_tiles * row_tile, MEL_PAD), jnp.float32),
        grid_spec=pltpu.PrefetchScalarGridSpec(
            num_scalar_prefetch=0,
            grid=(B, n_tiles),
            in_specs=[
                # main chunk tile: rows [i*row_tile, (i+1)*row_tile) of batch b
                pl.BlockSpec((None, row_tile, HOP), lambda b, i: (b, i, 0)),
                # 8-row tail right after the main tile (same HBM array, second operand)
                pl.BlockSpec((None, TAIL, HOP), lambda b, i: (b, (i + 1) * tail_blk, 0)),
                # grid-invariant weights
                pl.BlockSpec((N_FFT, 2 * FREQ_USED), lambda b, i: (0, 0)),
                pl.BlockSpec((FREQ_USED, MEL_PAD), lambda b, i: (0, 0)),
            ],
            out_specs=pl.BlockSpec((None, row_tile, MEL_PAD), lambda b, i: (b, i, 0)),
        ),
        compiler_params=pltpu.CompilerParams(
            dimension_semantics=("parallel", "parallel"),   # independent tiles -> megacore shard
            vmem_limit_bytes=48 << 20,                      # headroom on v7x's 64 MiB VMEM
        ),
    )(chunks, chunks, trig, fb)

    out = out[:, :n_frames, :N_MELS]                        # drop row/mel padding
    return jnp.transpose(out, (0, 2, 1))                    # (B, n_mels, n_frames)


if __name__ == "__main__":
    key = jax.random.PRNGKey(0)
    B, T = 2, 2048                                          # small waveform
    audio = jax.random.normal(key, (B, T), dtype=jnp.float32)

    feats = jax.jit(mel_extractor)(audio)
    jax.block_until_ready(feats)

    expected_frames = T // HOP + 1
    assert feats.shape == (B, N_MELS, expected_frames), feats.shape
    assert feats.dtype == jnp.float32
    assert bool(jnp.all(jnp.isfinite(feats)))
    print("KERNEL_OK")
</pallas_src>

<mosaic_0001>
module attributes {stable_mosaic.version = 11 : i64} {
  func.func @mel_kernel(%arg0: i32, %arg1: i32, %arg2: memref<1x16x256xbf16, #tpu.memory_space<vmem>>, %arg3: memref<1x8x256xbf16, #tpu.memory_space<vmem>>, %arg4: memref<1024x1024xbf16, #tpu.memory_space<vmem>>, %arg5: memref<512x128xbf16, #tpu.memory_space<vmem>>, %arg6: memref<1x16x128xf32, #tpu.memory_space<vmem>>) attributes {dimension_semantics = [#tpu.dimension_semantics<parallel>, #tpu.dimension_semantics<parallel>], iteration_bounds = array<i64: 2, 1>, scalar_prefetch = 0 : i64, scratch_operands = 0 : i64, tpu.core_type = #tpu.core_type<tc>, window_params = [{transform_indices = @transform_0, window_bounds = array<i64: 1, 16, 256>}, {transform_indices = @transform_1, window_bounds = array<i64: 1, 8, 256>}, {pipeline_mode = #tpu.pipeline_mode<synchronous>, transform_indices = @transform_2, window_bounds = array<i64: 1024, 1024>}, {pipeline_mode = #tpu.pipeline_mode<synchronous>, transform_indices = @transform_3, window_bounds = array<i64: 512, 128>}, {transform_indices = @transform_4, window_bounds = array<i64: 1, 16, 128>}]} {
    %c0 = arith.constant 0 : index
    %c0_0 = arith.constant 0 : index
    %c0_1 = arith.constant 0 : index
    %0 = vector.load %arg2[%c0, %c0_0, %c0_1] : memref<1x16x256xbf16, #tpu.memory_space<vmem>>, vector<1x16x256xbf16>
    %1 = vector.shape_cast %0 : vector<1x16x256xbf16> to vector<16x256xbf16>
    %2 = arith.extf %1 : vector<16x256xbf16> to vector<16x256xf32>
    %c0_2 = arith.constant 0 : index
    %c0_3 = arith.constant 0 : index
    %c0_4 = arith.constant 0 : index
    %3 = vector.load %arg3[%c0_2, %c0_3, %c0_4] : memref<1x8x256xbf16, #tpu.memory_space<vmem>>, vector<1x8x256xbf16>
    %4 = vector.shape_cast %3 : vector<1x8x256xbf16> to vector<8x256xbf16>
    %5 = arith.extf %4 : vector<8x256xbf16> to vector<8x256xf32>
    %6 = tpu.concatenate %2, %5 in 0 : vector<16x256xf32>, vector<8x256xf32> -> vector<24x256xf32>
    %c0_5 = arith.constant 0 : index
    %c0_6 = arith.constant 0 : index
    %7 = vector.load %arg4[%c0_5, %c0_6] : memref<1024x1024xbf16, #tpu.memory_space<vmem>>, vector<256x1024xbf16>
    %cst = arith.constant dense<0.000000e+00> : vector<16x1024xf32>
    %8 = tpu.matmul %1, %7, %cst {dimension_numbers = #tpu.dot_dimension_numbers<[1], [0], [0], [1], [0, 0, 1, 1], [], []>} : vector<16x256xbf16>, vector<256x1024xbf16>, vector<16x1024xf32> -> vector<16x1024xf32>
    %9 = vector.extract_strided_slice %6 {offsets = [1, 0], sizes = [16, 256], strides = [1, 1]} : vector<24x256xf32> to vector<16x256xf32>
    %10 = arith.truncf %9 : vector<16x256xf32> to vector<16x256xbf16>
    %c256 = arith.constant 256 : index
    %c0_7 = arith.constant 0 : index
    %11 = vector.load %arg4[%c256, %c0_7] : memref<1024x1024xbf16, #tpu.memory_space<vmem>>, vector<256x1024xbf16>
    %cst_8 = arith.constant dense<0.000000e+00> : vector<16x1024xf32>
    %12 = tpu.matmul %10, %11, %cst_8 {dimension_numbers = #tpu.dot_dimension_numbers<[1], [0], [0], [1], [0, 0, 1, 1], [], []>} : vector<16x256xbf16>, vector<256x1024xbf16>, vector<16x1024xf32> -> vector<16x1024xf32>
    %13 = arith.addf %8, %12 : vector<16x1024xf32>
    %14 = vector.extract_strided_slice %6 {offsets = [2, 0], sizes = [16, 256], strides = [1, 1]} : vector<24x256xf32> to vector<16x256xf32>
    %15 = arith.truncf %14 : vector<16x256xf32> to vector<16x256xbf16>
    %c512 = arith.constant 512 : index
    %c0_9 = arith.constant 0 : index
    %16 = vector.load %arg4[%c512, %c0_9] : memref<1024x1024xbf16, #tpu.memory_space<vmem>>, vector<256x1024xbf16>
    %cst_10 = arith.constant dense<0.000000e+00> : vector<16x1024xf32>
    %17 = tpu.matmul %15, %16, %cst_10 {dimension_numbers = #tpu.dot_dimension_numbers<[1], [0], [0], [1], [0, 0, 1, 1], [], []>} : vector<16x256xbf16>, vector<256x1024xbf16>, vector<16x1024xf32> -> vector<16x1024xf32>
    %18 = arith.addf %13, %17 : vector<16x1024xf32>
    %19 = vector.extract_strided_slice %6 {offsets = [3, 0], sizes = [16, 256], strides = [1, 1]} : vector<24x256xf32> to vector<16x256xf32>
    %20 = arith.truncf %19 : vector<16x256xf32> to vector<16x256xbf16>
    %c768 = arith.constant 768 : index
    %c0_11 = arith.constant 0 : index
    %21 = vector.load %arg4[%c768, %c0_11] : memref<1024x1024xbf16, #tpu.memory_space<vmem>>, vector<256x1024xbf16>
    %cst_12 = arith.constant dense<0.000000e+00> : vector<16x1024xf32>
    %22 = tpu.matmul %20, %21, %cst_12 {dimension_numbers = #tpu.dot_dimension_numbers<[1], [0], [0], [1], [0, 0, 1, 1], [], []>} : vector<16x256xbf16>, vector<256x1024xbf16>, vector<16x1024xf32> -> vector<16x1024xf32>
    %23 = arith.addf %18, %22 : vector<16x1024xf32>
    %24 = vector.extract_strided_slice %23 {offsets = [0, 0], sizes = [16, 512], strides = [1, 1]} : vector<16x1024xf32> to vector<16x512xf32>
    %25 = vector.extract_strided_slice %23 {offsets = [0, 512], sizes = [16, 512], strides = [1, 1]} : vector<16x1024xf32> to vector<16x512xf32>
    %26 = arith.mulf %24, %24 : vector<16x512xf32>
    %27 = arith.mulf %25, %25 : vector<16x512xf32>
    %28 = arith.addf %26, %27 : vector<16x512xf32>
    %29 = math.sqrt %28 : vector<16x512xf32>
    %30 = arith.truncf %29 : vector<16x512xf32> to vector<16x512xbf16>
    %c0_13 = arith.constant 0 : index
    %c0_14 = arith.constant 0 : index
    %31 = vector.load %arg5[%c0_13, %c0_14] : memref<512x128xbf16, #tpu.memory_space<vmem>>, vector<512x128xbf16>
    %cst_15 = arith.constant dense<0.000000e+00> : vector<16x128xf32>
    %32 = tpu.matmul %30, %31, %cst_15 {dimension_numbers = #tpu.dot_dimension_numbers<[1], [0], [0], [1], [0, 0, 1, 1], [], []>} : vector<16x512xbf16>, vector<512x128xbf16>, vector<16x128xf32> -> vector<16x128xf32>
    %cst_16 = arith.constant 1.000000e-07 : f32
    %33 = vector.broadcast %cst_16 : f32 to vector<16x128xf32>
    %34 = arith.maximumf %32, %33 : vector<16x128xf32>
    %35 = math.log %34 : vector<16x128xf32>
    %c0_17 = arith.constant 0 : index
    %c0_18 = arith.constant 0 : index
    %c0_19 = arith.constant 0 : index
    %36 = vector.load %arg6[%c0_17, %c0_18, %c0_19] : memref<1x16x128xf32, #tpu.memory_space<vmem>>, vector<1x16x128xf32>
    %37 = vector.shape_cast %36 : vector<1x16x128xf32> to vector<16x128xf32>
    %38 = vector.shape_cast %35 : vector<16x128xf32> to vector<1x16x128xf32>
    tpu.vector_store %arg6[%c0_17, %c0_18, %c0_19], %38 {strides = array<i32>} : memref<1x16x128xf32, #tpu.memory_space<vmem>>, vector<1x16x128xf32>,
    return
  }
  func.func @transform_0(%arg0: i32, %arg1: i32) -> (i32, i32, i32) {
    %c0_i32 = arith.constant 0 : i32
    %c0_i32_0 = arith.constant 0 : i32
    return %arg0, %arg1, %c0_i32 : i32, i32, i32
  }
  func.func @transform_1(%arg0: i32, %arg1: i32) -> (i32, i32, i32) {
    %c1_i32 = arith.constant 1 : i32
    %0 = arith.addi %arg1, %c1_i32 : i32
    %c2_i32 = arith.constant 2 : i32
    %1 = arith.muli %0, %c2_i32 : i32
    %c0_i32 = arith.constant 0 : i32
    %c0_i32_0 = arith.constant 0 : i32
    return %arg0, %1, %c0_i32 : i32, i32, i32
  }
  func.func @transform_2(%arg0: i32, %arg1: i32) -> (i32, i32) {
    %c0_i32 = arith.constant 0 : i32
    %c0_i32_0 = arith.constant 0 : i32
    %c0_i32_1 = arith.constant 0 : i32
    return %c0_i32, %c0_i32_0 : i32, i32
  }
  func.func @transform_3(%arg0: i32, %arg1: i32) -> (i32, i32) {
    %c0_i32 = arith.constant 0 : i32
    %c0_i32_0 = arith.constant 0 : i32
    %c0_i32_1 = arith.constant 0 : i32
    return %c0_i32, %c0_i32_0 : i32, i32
  }
  func.func @transform_4(%arg0: i32, %arg1: i32) -> (i32, i32, i32) {
    %c0_i32 = arith.constant 0 : i32
    %c0_i32_0 = arith.constant 0 : i32
    return %arg0, %arg1, %c0_i32 : i32, i32, i32
  }
}

</mosaic_0001>

<bundles_post_ra>
// kernel: mel_extractor.1
= control target key start
LH: loop header
LB: loop body
LE: loop exit
PB: predicated region body
PF: predicated region fallthrough
CT: control target
= control target key end

     0   :  { %s5474_s15 = smov 0   ;;  %s5476_s16 = smov 0   ;;  %s7315_s0 = inlined_call_operand.vmem [shape: bf16[2,24,256], index: 0, kind: input, shape index: {}, may-alias: {0,1}]   ;;  %s7316_s1 = inlined_call_operand.vmem [shape: bf16[2,24,256], index: 1, kind: input, shape index: {}, may-alias: {0,1}]   ;;  %s7317_s2 = inlined_call_operand.vmem [shape: bf16[1024,1024], index: 2, kind: input, shape index: {}]   ;;  %s7318_s3 = inlined_call_operand.vmem [shape: bf16[512,128], index: 3, kind: input, shape index: {}]   ;;  %s7319_s4 = inlined_call_operand.vmem [shape: f32[2,16,128], index: 4, kind: output, shape index: {}]  }
   0x1   :  { %s5478_s17 = smov 0  }
   0x2 LB: > { %s26_s18 = sadd.s32 1, %s5443_s16  ;;  %p4735_p0 = scmp.ge.s32.totalorder %s5447_s17, 1  ;;  %s5447_s17 = sphi %s5478_s17, %s14_s17   ;;  %s5443_s16 = sphi %s5476_s16, %s7321_s16   ;;  %s5439_s15 = sphi %s5474_s15, %s7320_s15  }
   0x3   : > { %p28_p1 = scmp.ge.s32.totalorder %s26_s18, 2  ;;  %p218_p2 = scmp.lt.s32.totalorder %s5447_s17, 3 }
   0x5   : > { %s7323_s18 = smov (%p28_p1, %s26_s18), 0  ;;  %p219_p3 = pnand %p4735_p0, %p218_p2 }
   0x6   : > { %p275_p4 = scmp.lt.s32.totalorder (!%p219_p3), %s5439_s15, 1 }
   0x7   : > { %222 = sbr.rel (%p219_p3) target bundleno = 977 (0x3d1), region = 36 }
   0xc   : > { %v511_v0 = vld [vmem:[%s7317_s2 + $0x5c0] sm:$0xff]  ;;  %v512_v2 = vld [vmem:[%s7317_s2 + $0x5c8] sm:$0xff]  ;;  %s7325_s15 = smov (!%p275_p4, %s5439_s15), 1  ;;  %vm583_vm0 = vsmask.f32 7424  ;;  %vm2376_vm1 = vcmask 1046528  }
   0xd   : > { %v515_v1 = vld [vmem:[%s7317_s2 + $0x5e0] sm:$0xff]  ;;  %v516_v4 = vld [vmem:[%s7317_s2 + $0x5e8] sm:$0xff]  ;;  %s5339_s11 = smul.u32 24, %s7325_s15  ;;  %vm3341_vm2 = vsmask.f32 6400  ;;  %s5294_s5 = sshll.u32 %s7325_s15, 4 }
   0xe   : > { %v4801_v3 = vcombine.high %v511_v0, %v515_v1  ;;  %v4800_v5 = vcombine.low %v511_v0, %v515_v1  ;;  %v503_v6 = vld [vmem:[%s7317_s2 + $0x580] sm:$0xff]  ;;  %v4803_v8 = vcombine.high %v512_v2, %v516_v4  ;;  %v4802_v9 = vcombine.low %v512_v2, %v516_v4  ;;  %v504_v11 = vld [vmem:[%s7317_s2 + $0x588] sm:$0xff]  ;;  %s311_s8 = scalar_lea.vmem %s7319_s4, %s5294_s5 }
   0xf   : > { %v507_v7 = vld [vmem:[%s7317_s2 + $0x5a0] sm:$0xff]  ;;  %v508_v12 = vld [vmem:[%s7317_s2 + $0x5a8] sm:$0xff]  ;;  %s5293_s24 = sadd.s32 16, %s5339_s11  ;;  %s5588_s9 = scalar_lea.vmem %s7315_s0, %s5339_s11 }
  0x10   : > { %v4793_v10 = vcombine.high %v503_v6, %v507_v7  ;;  %v495_v13 = vld [vmem:[%s7317_s2 + $0x540] sm:$0xff]  ;;  %1250 = vmatprep.subr.bf16.mxu0 %v4801_v3  ;;  %v4795_v14 = vcombine.high %v504_v11, %v508_v12  ;;  %v496_v16 = vld [vmem:[%s7317_s2 + $0x548] sm:$0xff]  ;;  %1293 = vmatprep.subr.bf16.mxu1 %v4803_v8  ;;  %v4792_v18 = vcombine.low %v503_v6, %v507_v7  ;;  %s300_s13 = scalar_lea.vmem %s7316_s1, %s5293_s24 }
  0x11   : > { %v499_v15 = vld [vmem:[%s7317_s2 + $0x560] sm:$0xff]  ;;  %v500_v17 = vld [vmem:[%s7317_s2 + $0x568] sm:$0xff]  ;;  %1251 = vmatpush1.bf16.msra.mxu0 %v4800_v5  ;;  %1294 = vmatpush1.bf16.msra.mxu1 %v4802_v9  ;;  %v4794_v19 = vcombine.low %v504_v11, %v508_v12 }
  0x12   : > { %1252 = vmatprep.subr.bf16.mxu0 %v4793_v10  ;;  %v4785_v20 = vcombine.high %v495_v13, %v499_v15  ;;  %1295 = vmatprep.subr.bf16.mxu1 %v4795_v14  ;;  %v4787_v21 = vcombine.high %v496_v16, %v500_v17  ;;  %v487_v22 = vld [vmem:[%s7317_s2 + $0x500] sm:$0xff]  ;;  %v488_v24 = vld [vmem:[%s7317_s2 + $0x508] sm:$0xff]  ;;  %v4784_v26 = vcombine.low %v495_v13, %v499_v15 }
  0x13   : > { %v491_v23 = vld [vmem:[%s7317_s2 + $0x520] sm:$0xff]  ;;  %v492_v25 = vld [vmem:[%s7317_s2 + $0x528] sm:$0xff]  ;;  %v4786_v27 = vcombine.low %v496_v16, %v500_v17 }
  0x14   : > { %v4777_v28 = vcombine.high %v487_v22, %v491_v23  ;;  %v4779_v29 = vcombine.high %v488_v24, %v492_v25  ;;  %v479_v30 = vld [vmem:[%s7317_s2 + $0x4c0] sm:$0xff]  ;;  %v480_v32 = vld [vmem:[%s7317_s2 + $0x4c8] sm:$0xff]  ;;  %v4776_v34 = vcombine.low %v487_v22, %v491_v23  ;;  %v4778_v35 = vcombine.low %v488_v24, %v492_v25 }
  0x15   : > { %1253 = vmatpush1.bf16.msra.mxu0 %v4792_v18  ;;  %1296 = vmatpush1.bf16.msra.mxu1 %v4794_v19  ;;  %v483_v31 = vld [vmem:[%s7317_s2 + $0x4e0] sm:$0xff]  ;;  %v484_v33 = vld [vmem:[%s7317_s2 + $0x4e8] sm:$0xff] }
  0x16   : > { %1254 = vmatprep.subr.bf16.mxu0 %v4785_v20  ;;  %1297 = vmatprep.subr.bf16.mxu1 %v4787_v21  ;;  %v4769_v36 = vcombine.high %v479_v30, %v483_v31  ;;  %v4771_v37 = vcombine.high %v480_v32, %v484_v33  ;;  %v471_v38 = vld [vmem:[%s7317_s2 + $0x480] sm:$0xff]  ;;  %v472_v40 = vld [vmem:[%s7317_s2 + $0x488] sm:$0xff]  ;;  %v4768_v42 = vcombine.low %v479_v30, %v483_v31 }
  0x17   : > { %v475_v39 = vld [vmem:[%s7317_s2 + $0x4a0] sm:$0xff]  ;;  %v476_v41 = vld [vmem:[%s7317_s2 + $0x4a8] sm:$0xff]  ;;  %v4770_v43 = vcombine.low %v480_v32, %v484_v33 }
  0x18   : > { %v4761_v44 = vcombine.high %v471_v38, %v475_v39  ;;  %v4763_v45 = vcombine.high %v472_v40, %v476_v41  ;;  %v463_v46 = vld [vmem:[%s7317_s2 + $0x440] sm:$0xff]  ;;  %v464_v48 = vld [vmem:[%s7317_s2 + $0x448] sm:$0xff]  ;;  %v4760_v50 = vcombine.low %v471_v38, %v475_v39  ;;  %v4762_v51 = vcombine.low %v472_v40, %v476_v41 }
  0x19   : > { %1255 = vmatpush1.bf16.msra.mxu0 %v4784_v26  ;;  %1298 = vmatpush1.bf16.msra.mxu1 %v4786_v27  ;;  %v467_v47 = vld [vmem:[%s7317_s2 + $0x460] sm:$0xff]  ;;  %v468_v49 = vld [vmem:[%s7317_s2 + $0x468] sm:$0xff] }
  0x1a   : > { %1256 = vmatprep.subr.bf16.mxu0 %v4777_v28  ;;  %1299 = vmatprep.subr.bf16.mxu1 %v4779_v29  ;;  %v4753_v52 = vcombine.high %v463_v46, %v467_v47  ;;  %v455_v53 = vld [vmem:[%s7317_s2 + $0x400] sm:$0xff]  ;;  %v4755_v54 = vcombine.high %v464_v48, %v468_v49  ;;  %v456_v58 = vld [vmem:[%s7317_s2 + $0x408] sm:$0xff]  ;;  %v4752_v61 = vcombine.low %v463_v46, %v467_v47 }
  0x1b   : > { %v459_v55 = vld [vmem:[%s7317_s2 + $0x420] sm:$0xff]  ;;  %v460_v59 = vld [vmem:[%s7317_s2 + $0x428] sm:$0xff]  ;;  %v4754_v0 = vcombine.low %v464_v48, %v468_v49 }
  0x1c   : > { %v5599_v56 = vld [vmem:[%s300_s13] sm:$0xff]  ;;  %v4745_v1 = vcombine.high %v455_v53, %v459_v55  ;;  %v4747_v3 = vcombine.high %v456_v58, %v460_v59  ;;  %v576_v7 = vld [vmem:[%s7317_s2 + $0x7c8] sm:$0xff]  ;;  %v4744_v10 = vcombine.low %v455_v53, %v459_v55  ;;  %v4746_v12 = vcombine.low %v456_v58, %v460_v59 }
  0x1d   : > { %1257 = vmatpush1.bf16.msra.mxu0 %v4776_v34  ;;  %1300 = vmatpush1.bf16.msra.mxu1 %v4778_v35  ;;  %v5602_v57 = vld [vmem:[%s5588_s9 + $0x4] ss:$8 sps:$4 sm:$0xff]   ;;  %v5612_v60 = vcombine.high %v5599_v56, %v5599_v56  ;;  %v5701_v53 = vld [vmem:[%s5588_s9] ss:$8 sps:$4 sm:$0xff]  }
  0x1e   : > { %1258 = vmatprep.subr.bf16.mxu0 %v4769_v36  ;;  %1301 = vmatprep.subr.bf16.mxu1 %v4771_v37  ;;  %v597_v62 = vshrl.u32 %v5602_v57, 16  ;;  %v599_v63 = vshll.u32 %v5602_v57, 16  ;;  %v575_v4 = vld [vmem:[%s7317_s2 + $0x7c0] sm:$0xff]  ;;  %v580_v8 = vld [vmem:[%s7317_s2 + $0x7e8] sm:$0xff] }
  0x1f   : > { %v604_v2 = vshll.u32 %v5612_v60, 16  ;;  %v579_v5 = vld [vmem:[%s7317_s2 + $0x7e0] sm:$0xff]  ;;  %v4867_v14 = vcombine.high %v576_v7, %v580_v8  ;;  %v568_v18 = vld [vmem:[%s7317_s2 + $0x788] sm:$0xff]  ;;  %v4866_v21 = vcombine.low %v576_v7, %v580_v8 }
  0x20   : > { %v601_v6 = vrot.slane %v599_v63, 1  ;;  %v4865_v13 = vcombine.high %v575_v4, %v579_v5  ;;  %v567_v15 = vld [vmem:[%s7317_s2 + $0x780] sm:$0xff]  ;;  %v572_v19 = vld [vmem:[%s7317_s2 + $0x7a8] sm:$0xff]  ;;  %v4864_v20 = vcombine.low %v575_v4, %v579_v5  ;;  %v5717_v4 = vcombine.low %v5599_v56, %v5599_v56 }
  0x21   : > { %1259 = vmatpush1.bf16.msra.mxu0 %v4768_v42  ;;  %1302 = vmatpush1.bf16.msra.mxu1 %v4770_v43  ;;  %v606_v9 = vrot.slane %v604_v2, 1  ;;  %v571_v16 = vld [vmem:[%s7317_s2 + $0x7a0] sm:$0xff]  ;;  %v4859_v23 = vcombine.high %v568_v18, %v572_v19  ;;  %v560_v26 = vld [vmem:[%s7317_s2 + $0x748] sm:$0xff]  ;;  %v4858_v29 = vcombine.low %v568_v18, %v572_v19  ;;  %v587_v5 = vshll.u32 %v5701_v53, 16 }
  0x22   : > { %1260 = vmatprep.subr.bf16.mxu0 %v4761_v44  ;;  %1303 = vmatprep.subr.bf16.mxu1 %v4763_v45  ;;  %v602_v11 = vor.u32 %v601_v6, %v597_v62  ;;  %v4857_v22 = vcombine.high %v567_v15, %v571_v16  ;;  %v559_v24 = vld [vmem:[%s7317_s2 + $0x740] sm:$0xff]  ;;  %v564_v27 = vld [vmem:[%s7317_s2 + $0x768] sm:$0xff]  ;;  %v4856_v28 = vcombine.low %v567_v15, %v571_v16  ;;  %v592_v15 = vshll.u32 %v5717_v4, 16 }
  0x23   : > { %v563_v25 = vld [vmem:[%s7317_s2 + $0x760] sm:$0xff]  ;;  %v4851_v31 = vcombine.high %v560_v26, %v564_v27  ;;  %v552_v34 = vld [vmem:[%s7317_s2 + $0x708] sm:$0xff]  ;;  %v4850_v37 = vcombine.low %v560_v26, %v564_v27 }
  0x24   : > { %v5642_v17 = vsel %vm583_vm0, %v602_v11, %v606_v9  ;;  %v4849_v30 = vcombine.high %v559_v24, %v563_v25  ;;  %v551_v32 = vld [vmem:[%s7317_s2 + $0x700] sm:$0xff]  ;;  %v556_v35 = vld [vmem:[%s7317_s2 + $0x728] sm:$0xff]  ;;  %v4848_v36 = vcombine.low %v559_v24, %v563_v25  ;;  %v594_v26 = vrot.slane %v592_v15, 1 }
  0x25   : > { %1261 = vmatpush1.bf16.msra.mxu0 %v4760_v50  ;;  %1304 = vmatpush1.bf16.msra.mxu1 %v4762_v51  ;;  %v555_v33 = vld [vmem:[%s7317_s2 + $0x720] sm:$0xff]  ;;  %v4843_v39 = vcombine.high %v552_v34, %v556_v35  ;;  %v544_v42 = vld [vmem:[%s7317_s2 + $0x6c8] sm:$0xff]  ;;  %v4842_v45 = vcombine.low %v552_v34, %v556_v35 }
  0x26   : > { %1262 = vmatprep.subr.bf16.mxu0 %v4753_v52  ;;  %1305 = vmatprep.subr.bf16.mxu1 %v4755_v54  ;;  %v4841_v38 = vcombine.high %v551_v32, %v555_v33  ;;  %v543_v40 = vld [vmem:[%s7317_s2 + $0x6c0] sm:$0xff]  ;;  %v548_v43 = vld [vmem:[%s7317_s2 + $0x6e8] sm:$0xff]  ;;  %v4840_v44 = vcombine.low %v551_v32, %v555_v33  ;;  %v506_v32 = vld [vmem:[%s7317_s2 + $0x598] sm:$0xff] }
  0x27   : > { %1282 = vmatprep.mubr.bf16.mxu0 %v5642_v17  ;;  %1325 = vmatprep.mubr.bf16.mxu1 %v5642_v17  ;;  %v547_v41 = vld [vmem:[%s7317_s2 + $0x6e0] sm:$0xff]  ;;  %v4835_v47 = vcombine.high %v544_v42, %v548_v43  ;;  %v536_v50 = vld [vmem:[%s7317_s2 + $0x688] sm:$0xff]  ;;  %v4834_v54 = vcombine.low %v544_v42, %v548_v43  ;;  %v510_v33 = vld [vmem:[%s7317_s2 + $0x5b8] sm:$0xff] }
  0x28   : > { %v4833_v46 = vcombine.high %v543_v40, %v547_v41  ;;  %v535_v48 = vld [vmem:[%s7317_s2 + $0x680] sm:$0xff]  ;;  %v540_v51 = vld [vmem:[%s7317_s2 + $0x6a8] sm:$0xff]  ;;  %v4832_v52 = vcombine.low %v543_v40, %v547_v41  ;;  %v501_v40 = vld [vmem:[%s7317_s2 + $0x570] sm:$0xff] }
  0x29   : > { %1263 = vmatpush1.bf16.msra.mxu0 %v4752_v61  ;;  %1306 = vmatpush1.bf16.msra.mxu1 %v4754_v0  ;;  %v539_v49 = vld [vmem:[%s7317_s2 + $0x6a0] sm:$0xff]  ;;  %v4827_v58 = vcombine.high %v536_v50, %v540_v51  ;;  %v528_v0 = vld [vmem:[%s7317_s2 + $0x648] sm:$0xff]  ;;  %v4826_v6 = vcombine.low %v536_v50, %v540_v51  ;;  %v498_v41 = vld [vmem:[%s7317_s2 + $0x558] sm:$0xff] }
  0x2a   : > { %1264 = vmatprep.subr.bf16.mxu0 %v4745_v1  ;;  %1307 = vmatprep.subr.bf16.mxu1 %v4747_v3  ;;  %v4825_v55 = vcombine.high %v535_v48, %v539_v49  ;;  %v527_v59 = vld [vmem:[%s7317_s2 + $0x640] sm:$0xff]  ;;  %v532_v1 = vld [vmem:[%s7317_s2 + $0x668] sm:$0xff]  ;;  %v4824_v3 = vcombine.low %v535_v48, %v539_v49  ;;  %v502_v42 = vld [vmem:[%s7317_s2 + $0x578] sm:$0xff] }
  0x2b   : > { %v531_v61 = vld [vmem:[%s7317_s2 + $0x660] sm:$0xff]  ;;  %v4819_v8 = vcombine.high %v528_v0, %v532_v1  ;;  %v520_v56 = vld [vmem:[%s7317_s2 + $0x608] sm:$0xff]  ;;  %v4818_v16 = vcombine.low %v528_v0, %v532_v1  ;;  %v490_v48 = vld [vmem:[%s7317_s2 + $0x518] sm:$0xff]  ;;  %v4791_v49 = vcombine.high %v498_v41, %v502_v42 }
  0x2c   : > { %v4817_v7 = vcombine.high %v527_v59, %v531_v61  ;;  %v519_v9 = vld [vmem:[%s7317_s2 + $0x600] sm:$0xff]  ;;  %v524_v11 = vld [vmem:[%s7317_s2 + $0x628] sm:$0xff]  ;;  %v494_v50 = vld [vmem:[%s7317_s2 + $0x538] sm:$0xff] }
  0x2d   : > { %1265 = vmatpush1.bf16.msra.mxu0 %v4744_v10  ;;  %1308 = vmatpush1.bf16.msra.mxu1 %v4746_v12  ;;  %v523_v10 = vld [vmem:[%s7317_s2 + $0x620] sm:$0xff]  ;;  %v4816_v12 = vcombine.low %v527_v59, %v531_v61  ;;  %v4811_v19 = vcombine.high %v520_v56, %v524_v11  ;;  %v4810_v27 = vcombine.low %v520_v56, %v524_v11  ;;  %v482_v59 = vld [vmem:[%s7317_s2 + $0x4d8] sm:$0xff] }
  0x2e   : > { %1266 = vmatprep.subr.bf16.mxu0 %v4865_v13  ;;  %1309 = vmatprep.subr.bf16.mxu1 %v4867_v14  ;;  %v585_v13 = vshrl.u32 %v5701_v53, 16  ;;  %v589_v14 = vrot.slane %v587_v5, 1  ;;  %v4809_v18 = vcombine.high %v519_v9, %v523_v10  ;;  %v4808_v24 = vcombine.low %v519_v9, %v523_v10  ;;  %v486_v61 = vld [vmem:[%s7317_s2 + $0x4f8] sm:$0xff] }
  0x2f   : > { %v4782_v1 = vcombine.low %v490_v48, %v494_v50  ;;  %v4775_v9 = vcombine.high %v482_v59, %v486_v61  ;;  %v478_v10 = vld [vmem:[%s7317_s2 + $0x4b8] sm:$0xff]  ;;  %v4774_v11 = vcombine.low %v482_v59, %v486_v61  ;;  %v553_v61 = vld [vmem:[%s7317_s2 + $0x710] sm:$0xff] }
  0x30   : > { %v590_v25 = vor.u32 %v589_v14, %v585_v13  ;;  %v465_v14 = vld [vmem:[%s7317_s2 + $0x450] sm:$0xff]  ;;  %v3272_v53 = vld [vmem:[%s7317_s2 + $0xdd8] sm:$0xff] }
  0x31   : > { %1267 = vmatpush2.bf16.msra.mxu0 %v4864_v20  ;;  %1310 = vmatpush2.bf16.msra.mxu1 %v4866_v21  ;;  %v513_v20 = vld [vmem:[%s7317_s2 + $0x5d0] sm:$0xff] }
  0x32   : > { %1268 = vmatprep.subr.bf16.mxu0 %v4857_v22  ;;  %1311 = vmatprep.subr.bf16.mxu1 %v4859_v23  ;;  %v517_v21 = vld [vmem:[%s7317_s2 + $0x5f0] sm:$0xff]  ;;  %v514_v22 = vld [vmem:[%s7317_s2 + $0x5d8] sm:$0xff]  ;;  %v5765_v34 = vsel %vm583_vm0, %v590_v25, %v594_v26 }
  0x33   : > { %v518_v23 = vld [vmem:[%s7317_s2 + $0x5f8] sm:$0xff]  ;;  %v4804_v35 = vcombine.low %v513_v20, %v517_v21  ;;  %v461_v25 = vld [vmem:[%s7317_s2 + $0x430] sm:$0xff] }
  0x34   : > { %v458_v26 = vld [vmem:[%s7317_s2 + $0x418] sm:$0xff] }
  0x35   : > { %1269 = vmatpush2.bf16.msra.mxu0 %v4856_v28  ;;  %1312 = vmatpush2.bf16.msra.mxu1 %v4858_v29  ;;  %v4805_v28 = vcombine.high %v513_v20, %v517_v21  ;;  %v4807_v29 = vcombine.high %v514_v22, %v518_v23  ;;  %v470_v20 = vld [vmem:[%s7317_s2 + $0x478] sm:$0xff] }
  0x36   : > { %1270 = vmatprep.subr.bf16.mxu0 %v4849_v30  ;;  %1313 = vmatprep.subr.bf16.mxu1 %v4851_v31  ;;  %v505_v30 = vld [vmem:[%s7317_s2 + $0x590] sm:$0xff] }
  0x37   : > { %v509_v31 = vld [vmem:[%s7317_s2 + $0x5b0] sm:$0xff] }
  0x38   : > { %v4796_v43 = vcombine.low %v505_v30, %v509_v31 }
  0x39   : > { %1271 = vmatpush2.bf16.msra.mxu0 %v4848_v36  ;;  %1314 = vmatpush2.bf16.msra.mxu1 %v4850_v37  ;;  %v4806_v36 = vcombine.low %v514_v22, %v518_v23  ;;  %v4797_v37 = vcombine.high %v505_v30, %v509_v31 }
  0x3a   : > { %1272 = vmatprep.subr.bf16.mxu0 %v4841_v38  ;;  %1315 = vmatprep.subr.bf16.mxu1 %v4843_v39  ;;  %v4799_v38 = vcombine.high %v506_v32, %v510_v33  ;;  %v497_v39 = vld [vmem:[%s7317_s2 + $0x550] sm:$0xff] }
  0x3b   : > { %v4788_v51 = vcombine.low %v497_v39, %v501_v40 }
  0x3d   : > { %1273 = vmatpush2.bf16.msra.mxu0 %v4840_v44  ;;  %1316 = vmatpush2.bf16.msra.mxu1 %v4842_v45  ;;  %v4798_v44 = vcombine.low %v506_v32, %v510_v33  ;;  %v4789_v45 = vcombine.high %v497_v39, %v501_v40  ;;  %v577_v32 = vld [vmem:[%s7317_s2 + $0x7d0] sm:$0xff] }
  0x3e   : > { %1274 = vmatprep.subr.bf16.mxu0 %v4833_v46  ;;  %1317 = vmatprep.subr.bf16.mxu1 %v4835_v47  ;;  %v489_v46 = vld [vmem:[%s7317_s2 + $0x510] sm:$0xff] }
  0x3f   : > { %v493_v47 = vld [vmem:[%s7317_s2 + $0x530] sm:$0xff] }
  0x40   : > { %v4780_v0 = vcombine.low %v489_v46, %v493_v47  ;;  %v581_v33 = vld [vmem:[%s7317_s2 + $0x7f0] sm:$0xff] }
  0x41   : > { %1275 = vmatpush2.bf16.msra.mxu0 %v4832_v52  ;;  %1318 = vmatpush2.bf16.msra.mxu1 %v4834_v54  ;;  %v4790_v52 = vcombine.low %v498_v41, %v502_v42  ;;  %v4781_v54 = vcombine.high %v489_v46, %v493_v47  ;;  %v4869_v40 = vcombine.high %v577_v32, %v581_v33  ;;  %v569_v41 = vld [vmem:[%s7317_s2 + $0x790] sm:$0xff] }
  0x42   : > { %1276 = vmatprep.subr.bf16.mxu0 %v4825_v55  ;;  %1319 = vmatprep.subr.bf16.mxu1 %v4827_v58  ;;  %v481_v55 = vld [vmem:[%s7317_s2 + $0x4d0] sm:$0xff]  ;;  %v4868_v46 = vcombine.low %v577_v32, %v581_v33 }
  0x43   : > { %v485_v58 = vld [vmem:[%s7317_s2 + $0x4f0] sm:$0xff] }
  0x44   : > { %v4772_v56 = vcombine.low %v481_v55, %v485_v58  ;;  %v573_v42 = vld [vmem:[%s7317_s2 + $0x7b0] sm:$0xff] }
  0x45   : > { %1277 = vmatpush2.bf16.msra.mxu0 %v4824_v3  ;;  %1320 = vmatpush2.bf16.msra.mxu1 %v4826_v6  ;;  %v4773_v3 = vcombine.high %v481_v55, %v485_v58  ;;  %v473_v6 = vld [vmem:[%s7317_s2 + $0x490] sm:$0xff]  ;;  %v4860_v55 = vcombine.low %v569_v41, %v573_v42 }
  0x46   : > { %1278 = vmatprep.subr.bf16.mxu0 %v4817_v7  ;;  %1321 = vmatprep.subr.bf16.mxu1 %v4819_v8  ;;  %v477_v7 = vld [vmem:[%s7317_s2 + $0x4b0] sm:$0xff]  ;;  %v474_v8 = vld [vmem:[%s7317_s2 + $0x498] sm:$0xff] }
  0x47   : > { %v4764_v21 = vcombine.low %v473_v6, %v477_v7  ;;  %v4766_v22 = vcombine.low %v474_v8, %v478_v10 }
  0x49   : > { %1279 = vmatpush2.bf16.msra.mxu0 %v4816_v12  ;;  %1322 = vmatpush2.bf16.msra.mxu1 %v4818_v16  ;;  %v4765_v12 = vcombine.high %v473_v6, %v477_v7  ;;  %v469_v16 = vld [vmem:[%s7317_s2 + $0x470] sm:$0xff] }
  0x4a   : > { %1280 = vmatprep.subr.bf16.mxu0 %v4809_v18  ;;  %1323 = vmatprep.subr.bf16.mxu1 %v4811_v19  ;;  %v466_v18 = vld [vmem:[%s7317_s2 + $0x458] sm:$0xff]  ;;  %v4767_v19 = vcombine.high %v474_v8, %v478_v10  ;;  %v4757_v23 = vcombine.high %v465_v14, %v469_v16  ;;  %v545_v10 = vld [vmem:[%s7317_s2 + $0x6d0] sm:$0xff] }
  0x4b   : > { %v4758_v30 = vcombine.low %v466_v18, %v470_v20 }
  0x4d   : > { %1281 = vmatpush2.bf16.msra.mxu0 %v4808_v24  ;;  %1324 = vmatpush2.bf16.msra.mxu1 %v4810_v27  ;;  %v457_v24 = vld [vmem:[%s7317_s2 + $0x410] sm:$0xff]  ;;  %v4759_v27 = vcombine.high %v466_v18, %v470_v20 }
  0x4e   : > { %1336 = vmatprep.subr.bf16.mxu0 %v4805_v28  ;;  %1379 = vmatprep.subr.bf16.mxu1 %v4807_v29  ;;  %v462_v28 = vld [vmem:[%s7317_s2 + $0x438] sm:$0xff]  ;;  %v4756_v29 = vcombine.low %v465_v14, %v469_v16  ;;  %v4749_v31 = vcombine.high %v457_v24, %v461_v25  ;;  %v537_v20 = vld [vmem:[%s7317_s2 + $0x690] sm:$0xff] }
  0x4f   : > { %v4750_v39 = vcombine.low %v458_v26, %v462_v28 }
  0x50   : > { %1283 = vmatmul.mubr.bf16.vlgmr.msra.gmra.mxu0 %v5765_v34  ;;  %1326 = vmatmul.mubr.bf16.vlgmr.msra.gmra.mxu1 %v5765_v34 }
  0x51   : > { %1337 = vmatpush1.bf16.msra.mxu0 %v4804_v35  ;;  %1380 = vmatpush1.bf16.msra.mxu1 %v4806_v36  ;;  %v578_v35 = vld [vmem:[%s7317_s2 + $0x7d8] sm:$0xff]  ;;  %v4751_v36 = vcombine.high %v458_v26, %v462_v28  ;;  %v529_v28 = vld [vmem:[%s7317_s2 + $0x650] sm:$0xff] }
  0x52   : > { %1338 = vmatprep.subr.bf16.mxu0 %v4797_v37  ;;  %1381 = vmatprep.subr.bf16.mxu1 %v4799_v38  ;;  %v582_v37 = vld [vmem:[%s7317_s2 + $0x7f8] sm:$0xff]  ;;  %v4748_v38 = vcombine.low %v457_v24, %v461_v25 }
  0x53   : > { %1368 = vmatprep.mubr.bf16.mxu0 %v5642_v17  ;;  %1411 = vmatprep.mubr.bf16.mxu1 %v5642_v17  ;;  %v4783_v17 = vcombine.high %v490_v48, %v494_v50  ;;  %v4870_v47 = vcombine.low %v578_v35, %v582_v37  ;;  %v4861_v48 = vcombine.high %v569_v41, %v573_v42 }
  0x55   : > { %1339 = vmatpush1.bf16.msra.mxu0 %v4796_v43  ;;  %1382 = vmatpush1.bf16.msra.mxu1 %v4798_v44  ;;  %v570_v43 = vld [vmem:[%s7317_s2 + $0x798] sm:$0xff]  ;;  %v4871_v44 = vcombine.high %v578_v35, %v582_v37  ;;  %v521_v37 = vld [vmem:[%s7317_s2 + $0x610] sm:$0xff] }
  0x56   : > { %1340 = vmatprep.subr.bf16.mxu0 %v4789_v45  ;;  %1383 = vmatprep.subr.bf16.mxu1 %v4791_v49  ;;  %v574_v45 = vld [vmem:[%s7317_s2 + $0x7b8] sm:$0xff]  ;;  %v561_v49 = vld [vmem:[%s7317_s2 + $0x750] sm:$0xff] }
  0x57   : > { %v4863_v50 = vcombine.high %v570_v43, %v574_v45  ;;  %v4862_v58 = vcombine.low %v570_v43, %v574_v45  ;;  %v379_v45 = vld [vmem:[%s7317_s2 + $0x1c0] sm:$0xff] }
  0x59   : > { %1341 = vmatpush1.bf16.msra.mxu0 %v4788_v51  ;;  %1384 = vmatpush1.bf16.msra.mxu1 %v4790_v52  ;;  %v565_v51 = vld [vmem:[%s7317_s2 + $0x770] sm:$0xff]  ;;  %v562_v52 = vld [vmem:[%s7317_s2 + $0x758] sm:$0xff] }
  0x5a   : > { %1342 = vmatprep.subr.bf16.mxu0 %v4781_v54  ;;  %1385 = vmatprep.subr.bf16.mxu1 %v4783_v17  ;;  %v566_v54 = vld [vmem:[%s7317_s2 + $0x778] sm:$0xff]  ;;  %v4853_v59 = vcombine.high %v561_v49, %v565_v51  ;;  %v4852_v6 = vcombine.low %v561_v49, %v565_v51 }
  0x5b   : > { %v4855_v17 = vcombine.high %v562_v52, %v566_v54  ;;  %v4854_v7 = vcombine.low %v562_v52, %v566_v54  ;;  %v371_v54 = vld [vmem:[%s7317_s2 + $0x180] sm:$0xff] }
  0x5d   : > { %1343 = vmatpush1.bf16.msra.mxu0 %v4780_v0  ;;  %1386 = vmatpush1.bf16.msra.mxu1 %v4782_v1  ;;  %v557_v0 = vld [vmem:[%s7317_s2 + $0x730] sm:$0xff]  ;;  %v554_v1 = vld [vmem:[%s7317_s2 + $0x718] sm:$0xff] }
  0x5e   : > { %1344 = vmatprep.subr.bf16.mxu0 %v4773_v3  ;;  %1387 = vmatprep.subr.bf16.mxu1 %v4775_v9  ;;  %v558_v3 = vld [vmem:[%s7317_s2 + $0x738] sm:$0xff]  ;;  %v4845_v8 = vcombine.high %v553_v61, %v557_v0  ;;  %v4844_v14 = vcombine.low %v553_v61, %v557_v0 }
  0x5f   : > { %v4847_v9 = vcombine.high %v554_v1, %v558_v3  ;;  %v4846_v16 = vcombine.low %v554_v1, %v558_v3  ;;  %v363_v3 = vld [vmem:[%s7317_s2 + $0x140] sm:$0xff] }
  0x61   : > { %1345 = vmatpush1.bf16.msra.mxu0 %v4772_v56  ;;  %1388 = vmatpush1.bf16.msra.mxu1 %v4774_v11  ;;  %v549_v56 = vld [vmem:[%s7317_s2 + $0x6f0] sm:$0xff]  ;;  %v546_v11 = vld [vmem:[%s7317_s2 + $0x6d8] sm:$0xff] }
  0x62   : > { %1346 = vmatprep.subr.bf16.mxu0 %v4765_v12  ;;  %1389 = vmatprep.subr.bf16.mxu1 %v4767_v19  ;;  %v550_v12 = vld [vmem:[%s7317_s2 + $0x6f8] sm:$0xff]  ;;  %v4837_v18 = vcombine.high %v545_v10, %v549_v56  ;;  %v4836_v24 = vcombine.low %v545_v10, %v549_v56 }
  0x63   : > { %v4839_v19 = vcombine.high %v546_v11, %v550_v12  ;;  %v4838_v25 = vcombine.low %v546_v11, %v550_v12  ;;  %v355_v12 = vld [vmem:[%s7317_s2 + $0x100] sm:$0xff] }
  0x65   : > { %1347 = vmatpush1.bf16.msra.mxu0 %v4764_v21  ;;  %1390 = vmatpush1.bf16.msra.mxu1 %v4766_v22  ;;  %v541_v21 = vld [vmem:[%s7317_s2 + $0x6b0] sm:$0xff]  ;;  %v538_v22 = vld [vmem:[%s7317_s2 + $0x698] sm:$0xff] }
  0x66   : > { %1348 = vmatprep.subr.bf16.mxu0 %v4757_v23  ;;  %1391 = vmatprep.subr.bf16.mxu1 %v4759_v27  ;;  %v542_v23 = vld [vmem:[%s7317_s2 + $0x6b8] sm:$0xff]  ;;  %v4829_v26 = vcombine.high %v537_v20, %v541_v21  ;;  %v4828_v32 = vcombine.low %v537_v20, %v541_v21 }
  0x67   : > { %v4831_v27 = vcombine.high %v538_v22, %v542_v23  ;;  %v4830_v33 = vcombine.low %v538_v22, %v542_v23  ;;  %v347_v22 = vld [vmem:[%s7317_s2 + $0xc0] sm:$0xff] }
  0x68   : > { %v351_v23 = vld [vmem:[%s7317_s2 + $0xe0] sm:$0xff] }
  0x69   : > { %1349 = vmatpush1.bf16.msra.mxu0 %v4756_v29  ;;  %1392 = vmatpush1.bf16.msra.mxu1 %v4758_v30  ;;  %v533_v29 = vld [vmem:[%s7317_s2 + $0x670] sm:$0xff]  ;;  %v530_v30 = vld [vmem:[%s7317_s2 + $0x658] sm:$0xff] }
  0x6a   : > { %1350 = vmatprep.subr.bf16.mxu0 %v4749_v31  ;;  %1393 = vmatprep.subr.bf16.mxu1 %v4751_v36  ;;  %v534_v31 = vld [vmem:[%s7317_s2 + $0x678] sm:$0xff]  ;;  %v4821_v35 = vcombine.high %v529_v28, %v533_v29  ;;  %v4820_v41 = vcombine.low %v529_v28, %v533_v29  ;;  %v4899_v28 = vcombine.high %v347_v22, %v351_v23 }
  0x6b   : > { %v4823_v36 = vcombine.high %v530_v30, %v534_v31  ;;  %v4822_v42 = vcombine.low %v530_v30, %v534_v31  ;;  %v339_v30 = vld [vmem:[%s7317_s2 + $0x80] sm:$0xff] }
  0x6c   : > { %v343_v31 = vld [vmem:[%s7317_s2 + $0xa0] sm:$0xff] }
  0x6d   : > { %1351 = vmatpush1.bf16.msra.mxu0 %v4748_v38  ;;  %1394 = vmatpush1.bf16.msra.mxu1 %v4750_v39  ;;  %v525_v38 = vld [vmem:[%s7317_s2 + $0x630] sm:$0xff]  ;;  %v522_v39 = vld [vmem:[%s7317_s2 + $0x618] sm:$0xff] }
  0x6e   : > { %1352 = vmatprep.subr.bf16.mxu0 %v4869_v40  ;;  %1395 = vmatprep.subr.bf16.mxu1 %v4871_v44  ;;  %v526_v40 = vld [vmem:[%s7317_s2 + $0x638] sm:$0xff]  ;;  %v4813_v43 = vcombine.high %v521_v37, %v525_v38  ;;  %v4812_v49 = vcombine.low %v521_v37, %v525_v38  ;;  %v4891_v37 = vcombine.high %v339_v30, %v343_v31 }
  0x6f   : > { %v4815_v44 = vcombine.high %v522_v39, %v526_v40 }
  0x71   : > { %1353 = vmatpush2.bf16.msra.mxu0 %v4868_v46  ;;  %1396 = vmatpush2.bf16.msra.mxu1 %v4870_v47  ;;  %v383_v46 = vld [vmem:[%s7317_s2 + $0x1e0] sm:$0xff]  ;;  %v380_v47 = vld [vmem:[%s7317_s2 + $0x1c8] sm:$0xff] }
  0x72   : > { %1354 = vmatprep.subr.bf16.mxu0 %v4861_v48  ;;  %1397 = vmatprep.subr.bf16.mxu1 %v4863_v50  ;;  %v384_v48 = vld [vmem:[%s7317_s2 + $0x1e8] sm:$0xff]  ;;  %v4814_v50 = vcombine.low %v522_v39, %v526_v40  ;;  %v4931_v51 = vcombine.high %v379_v45, %v383_v46  ;;  %v331_v39 = vld [vmem:[%s7317_s2 + $0x40] sm:$0xff] }
  0x73   : > { %v4933_v52 = vcombine.high %v380_v47, %v384_v48  ;;  %v4932_v61 = vcombine.low %v380_v47, %v384_v48  ;;  %v335_v40 = vld [vmem:[%s7317_s2 + $0x60] sm:$0xff] }
  0x74   : > { %v323_v47 = vld [vmem:[%s7317_s2] sm:$0xff] }
  0x75   : > { %1355 = vmatpush2.bf16.msra.mxu0 %v4860_v55  ;;  %1398 = vmatpush2.bf16.msra.mxu1 %v4862_v58  ;;  %v375_v55 = vld [vmem:[%s7317_s2 + $0x1a0] sm:$0xff]  ;;  %v372_v58 = vld [vmem:[%s7317_s2 + $0x188] sm:$0xff] }
  0x76   : > { %1356 = vmatprep.subr.bf16.mxu0 %v4853_v59  ;;  %1399 = vmatprep.subr.bf16.mxu1 %v4855_v17  ;;  %v376_v59 = vld [vmem:[%s7317_s2 + $0x1a8] sm:$0xff]  ;;  %v4930_v17 = vcombine.low %v379_v45, %v383_v46  ;;  %v4923_v0 = vcombine.high %v371_v54, %v375_v55  ;;  %v4883_v45 = vcombine.high %v331_v39, %v335_v40  ;;  %v327_v48 = vld [vmem:[%s7317_s2 + $0x20] sm:$0xff] }
  0x77   : > { %v4925_v1 = vcombine.high %v372_v58, %v376_v59  ;;  %v4924_v10 = vcombine.low %v372_v58, %v376_v59  ;;  %v443_v58 = vld [vmem:[%s7317_s2 + $0x3c0] sm:$0xff] }
  0x78   : > { %v447_v59 = vld [vmem:[%s7317_s2 + $0x3e0] sm:$0xff] }
  0x79   : > { %1357 = vmatpush2.bf16.msra.mxu0 %v4852_v6  ;;  %1400 = vmatpush2.bf16.msra.mxu1 %v4854_v7  ;;  %v367_v6 = vld [vmem:[%s7317_s2 + $0x160] sm:$0xff]  ;;  %v364_v7 = vld [vmem:[%s7317_s2 + $0x148] sm:$0xff] }
  0x7a   : > { %1358 = vmatprep.subr.bf16.mxu0 %v4845_v8  ;;  %1401 = vmatprep.subr.bf16.mxu1 %v4847_v9  ;;  %v368_v8 = vld [vmem:[%s7317_s2 + $0x168] sm:$0xff]  ;;  %v4922_v9 = vcombine.low %v371_v54, %v375_v55  ;;  %v4915_v56 = vcombine.high %v363_v3, %v367_v6  ;;  %v4875_v54 = vcombine.high %v323_v47, %v327_v48 }
  0x7b   : > { %v4917_v11 = vcombine.high %v364_v7, %v368_v8 }
  0x7d   : > { %1359 = vmatpush2.bf16.msra.mxu0 %v4844_v14  ;;  %1402 = vmatpush2.bf16.msra.mxu1 %v4846_v16  ;;  %v359_v14 = vld [vmem:[%s7317_s2 + $0x120] sm:$0xff]  ;;  %v360_v16 = vld [vmem:[%s7317_s2 + $0x128] sm:$0xff] }
  0x7e   : > { %1360 = vmatprep.subr.bf16.mxu0 %v4837_v18  ;;  %1403 = vmatprep.subr.bf16.mxu1 %v4839_v19  ;;  %v4914_v18 = vcombine.low %v363_v3, %v367_v6  ;;  %v4916_v19 = vcombine.low %v364_v7, %v368_v8  ;;  %v4907_v20 = vcombine.high %v355_v12, %v359_v14  ;;  %v435_v7 = vld [vmem:[%s7317_s2 + $0x380] sm:$0xff] }
  0x7f   : > { %v4995_v3 = vcombine.high %v443_v58, %v447_v59  ;;  %v439_v8 = vld [vmem:[%s7317_s2 + $0x3a0] sm:$0xff] }
  0x81   : > { %1361 = vmatpush2.bf16.msra.mxu0 %v4836_v24  ;;  %1404 = vmatpush2.bf16.msra.mxu1 %v4838_v25  ;;  %v348_v24 = vld [vmem:[%s7317_s2 + $0xc8] sm:$0xff] }
  0x82   : > { %1362 = vmatprep.subr.bf16.mxu0 %v4829_v26  ;;  %1405 = vmatprep.subr.bf16.mxu1 %v4831_v27  ;;  %v352_v25 = vld [vmem:[%s7317_s2 + $0xe8] sm:$0xff]  ;;  %v4906_v26 = vcombine.low %v355_v12, %v359_v14  ;;  %v4987_v12 = vcombine.high %v435_v7, %v439_v8 }
  0x83   : > { %v4901_v29 = vcombine.high %v348_v24, %v352_v25 }
  0x85   : > { %1363 = vmatpush2.bf16.msra.mxu0 %v4828_v32  ;;  %1406 = vmatpush2.bf16.msra.mxu1 %v4830_v33  ;;  %v340_v32 = vld [vmem:[%s7317_s2 + $0x88] sm:$0xff] }
  0x86   : > { %1364 = vmatprep.subr.bf16.mxu0 %v4821_v35  ;;  %1407 = vmatprep.subr.bf16.mxu1 %v4823_v36  ;;  %v344_v33 = vld [vmem:[%s7317_s2 + $0xa8] sm:$0xff]  ;;  %v4898_v35 = vcombine.low %v347_v22, %v351_v23  ;;  %v4900_v36 = vcombine.low %v348_v24, %v352_v25  ;;  %v419_v24 = vld [vmem:[%s7317_s2 + $0x300] sm:$0xff] }
  0x87   : > { %v4893_v38 = vcombine.high %v340_v32, %v344_v33  ;;  %v423_v25 = vld [vmem:[%s7317_s2 + $0x320] sm:$0xff] }
  0x89   : > { %1365 = vmatpush2.bf16.msra.mxu0 %v4820_v41  ;;  %1408 = vmatpush2.bf16.msra.mxu1 %v4822_v42  ;;  %v332_v41 = vld [vmem:[%s7317_s2 + $0x48] sm:$0xff] }
  0x8a   : > { %1366 = vmatprep.subr.bf16.mxu0 %v4813_v43  ;;  %1409 = vmatprep.subr.bf16.mxu1 %v4815_v44  ;;  %v336_v42 = vld [vmem:[%s7317_s2 + $0x68] sm:$0xff]  ;;  %v4890_v43 = vcombine.low %v339_v30, %v343_v31  ;;  %v4892_v44 = vcombine.low %v340_v32, %v344_v33  ;;  %v4971_v30 = vcombine.high %v419_v24, %v423_v25  ;;  %v411_v32 = vld [vmem:[%s7317_s2 + $0x2c0] sm:$0xff] }
  0x8b   : > { %v4885_v46 = vcombine.high %v332_v41, %v336_v42  ;;  %v415_v33 = vld [vmem:[%s7317_s2 + $0x2e0] sm:$0xff] }
  0x8d   : > { %1367 = vmatpush2.bf16.msra.mxu0 %v4812_v49  ;;  %1410 = vmatpush2.bf16.msra.mxu1 %v4814_v50  ;;  %v324_v49 = vld [vmem:[%s7317_s2 + $0x8] sm:$0xff] }
  0x8e   : > { %2072 = vmatprep.subr.bf16.mxu0 %v4931_v51  ;;  %2115 = vmatprep.subr.bf16.mxu1 %v4933_v52  ;;  %v328_v50 = vld [vmem:[%s7317_s2 + $0x28] sm:$0xff]  ;;  %v4882_v51 = vcombine.low %v331_v39, %v335_v40  ;;  %v4884_v52 = vcombine.low %v332_v41, %v336_v42  ;;  %v4963_v39 = vcombine.high %v411_v32, %v415_v33  ;;  %v403_v41 = vld [vmem:[%s7317_s2 + $0x280] sm:$0xff] }
  0x8f   : > { %v4877_v55 = vcombine.high %v324_v49, %v328_v50  ;;  %v407_v42 = vld [vmem:[%s7317_s2 + $0x2a0] sm:$0xff] }
  0x90   : > { %1369 = vmatmul.mubr.bf16.vlgmr.msra.gmra.mxu0 %v5765_v34  ;;  %1412 = vmatmul.mubr.bf16.vlgmr.msra.gmra.mxu1 %v5765_v34  ;;  %v356_v34 = vld [vmem:[%s7317_s2 + $0x108] sm:$0xff] }
  0x91   : > { %2073 = vmatpush1.bf16.msra.mxu0 %v4930_v17  ;;  %2116 = vmatpush1.bf16.msra.mxu1 %v4932_v61  ;;  %v4909_v21 = vcombine.high %v356_v34, %v360_v16  ;;  %v4908_v27 = vcombine.low %v356_v34, %v360_v16  ;;  %v444_v17 = vld [vmem:[%s7317_s2 + $0x3c8] sm:$0xff]  ;;  %v427_v34 = vld [vmem:[%s7317_s2 + $0x340] sm:$0xff] }
  0x92   : > { %2074 = vmatprep.subr.bf16.mxu0 %v4923_v0  ;;  %2117 = vmatprep.subr.bf16.mxu1 %v4925_v1  ;;  %v448_v61 = vld [vmem:[%s7317_s2 + $0x3e8] sm:$0xff]  ;;  %v4874_v0 = vcombine.low %v323_v47, %v327_v48  ;;  %v4876_v1 = vcombine.low %v324_v49, %v328_v50  ;;  %v431_v16 = vld [vmem:[%s7317_s2 + $0x360] sm:$0xff]  ;;  %v4955_v47 = vcombine.high %v403_v41, %v407_v42 }
  0x93   : > { %2104 = vmatprep.mubr.bf16.mxu0 %v5602_v57  ;;  %2147 = vmatprep.mubr.bf16.mxu1 %v5602_v57  ;;  %v4997_v6 = vcombine.high %v444_v17, %v448_v61  ;;  %v4979_v22 = vcombine.high %v427_v34, %v431_v16  ;;  %v395_v49 = vld [vmem:[%s7317_s2 + $0x240] sm:$0xff] }
  0x94   : > { %v399_v50 = vld [vmem:[%s7317_s2 + $0x260] sm:$0xff] }
  0x95   : > { %2075 = vmatpush1.bf16.msra.mxu0 %v4922_v9  ;;  %2118 = vmatpush1.bf16.msra.mxu1 %v4924_v10  ;;  %v436_v9 = vld [vmem:[%s7317_s2 + $0x388] sm:$0xff]  ;;  %v3265_v57 = vld [vmem:[%s7317_s2 + $0xda0] sm:$0xff] }
  0x96   : > { %2076 = vmatprep.subr.bf16.mxu0 %v4915_v56  ;;  %2119 = vmatprep.subr.bf16.mxu1 %v4917_v11  ;;  %v440_v10 = vld [vmem:[%s7317_s2 + $0x3a8] sm:$0xff]  ;;  %v4994_v56 = vcombine.low %v443_v58, %v447_v59  ;;  %v4996_v11 = vcombine.low %v444_v17, %v448_v61  ;;  %v4947_v58 = vcombine.high %v395_v49, %v399_v50  ;;  %v387_v17 = vld [vmem:[%s7317_s2 + $0x200] sm:$0xff] }
  0x97   : > { %v4989_v14 = vcombine.high %v436_v9, %v440_v10  ;;  %v391_v61 = vld [vmem:[%s7317_s2 + $0x220] sm:$0xff] }
  0x99   : > { %2077 = vmatpush1.bf16.msra.mxu0 %v4914_v18  ;;  %2120 = vmatpush1.bf16.msra.mxu1 %v4916_v19  ;;  %v428_v18 = vld [vmem:[%s7317_s2 + $0x348] sm:$0xff] }
  0x9a   : > { %2078 = vmatprep.subr.bf16.mxu0 %v4907_v20  ;;  %2121 = vmatprep.subr.bf16.mxu1 %v4909_v21  ;;  %v432_v19 = vld [vmem:[%s7317_s2 + $0x368] sm:$0xff]  ;;  %v4986_v20 = vcombine.low %v435_v7, %v439_v8  ;;  %v4988_v21 = vcombine.low %v436_v9, %v440_v10  ;;  %v4939_v7 = vcombine.high %v387_v17, %v391_v61  ;;  %v381_v9 = vld [vmem:[%s7317_s2 + $0x1d0] sm:$0xff] }
  0x9b   : > { %v4981_v23 = vcombine.high %v428_v18, %v432_v19  ;;  %v385_v10 = vld [vmem:[%s7317_s2 + $0x1f0] sm:$0xff] }
  0x9d   : > { %2079 = vmatpush1.bf16.msra.mxu0 %v4906_v26  ;;  %2122 = vmatpush1.bf16.msra.mxu1 %v4908_v27  ;;  %v420_v26 = vld [vmem:[%s7317_s2 + $0x308] sm:$0xff] }
  0x9e   : > { %2080 = vmatprep.subr.bf16.mxu0 %v4899_v28  ;;  %2123 = vmatprep.subr.bf16.mxu1 %v4901_v29  ;;  %v424_v27 = vld [vmem:[%s7317_s2 + $0x328] sm:$0xff]  ;;  %v4978_v28 = vcombine.low %v427_v34, %v431_v16  ;;  %v4980_v29 = vcombine.low %v428_v18, %v432_v19  ;;  %v4935_v34 = vcombine.high %v381_v9, %v385_v10  ;;  %v373_v18 = vld [vmem:[%s7317_s2 + $0x190] sm:$0xff] }
  0x9f   : > { %v4973_v31 = vcombine.high %v420_v26, %v424_v27  ;;  %v377_v19 = vld [vmem:[%s7317_s2 + $0x1b0] sm:$0xff] }
  0xa1   : > { %2081 = vmatpush1.bf16.msra.mxu0 %v4898_v35  ;;  %2124 = vmatpush1.bf16.msra.mxu1 %v4900_v36  ;;  %v412_v35 = vld [vmem:[%s7317_s2 + $0x2c8] sm:$0xff] }
  0xa2   : > { %2082 = vmatprep.subr.bf16.mxu0 %v4891_v37  ;;  %2125 = vmatprep.subr.bf16.mxu1 %v4893_v38  ;;  %v416_v36 = vld [vmem:[%s7317_s2 + $0x2e8] sm:$0xff]  ;;  %v4970_v37 = vcombine.low %v419_v24, %v423_v25  ;;  %v4972_v38 = vcombine.low %v420_v26, %v424_v27  ;;  %v4927_v24 = vcombine.high %v373_v18, %v377_v19  ;;  %v365_v26 = vld [vmem:[%s7317_s2 + $0x150] sm:$0xff] }
  0xa3   : > { %v4965_v40 = vcombine.high %v412_v35, %v416_v36  ;;  %v369_v27 = vld [vmem:[%s7317_s2 + $0x170] sm:$0xff] }
  0xa5   : > { %2083 = vmatpush1.bf16.msra.mxu0 %v4890_v43  ;;  %2126 = vmatpush1.bf16.msra.mxu1 %v4892_v44  ;;  %v404_v43 = vld [vmem:[%s7317_s2 + $0x288] sm:$0xff] }
  0xa6   : > { %2084 = vmatprep.subr.bf16.mxu0 %v4883_v45  ;;  %2127 = vmatprep.subr.bf16.mxu1 %v4885_v46  ;;  %v408_v44 = vld [vmem:[%s7317_s2 + $0x2a8] sm:$0xff]  ;;  %v4962_v45 = vcombine.low %v411_v32, %v415_v33  ;;  %v4964_v46 = vcombine.low %v412_v35, %v416_v36  ;;  %v4919_v33 = vcombine.high %v365_v26, %v369_v27  ;;  %v357_v36 = vld [vmem:[%s7317_s2 + $0x110] sm:$0xff] }
  0xa7   : > { %v4957_v48 = vcombine.high %v404_v43, %v408_v44 }
  0xa9   : > { %2085 = vmatpush1.bf16.msra.mxu0 %v4882_v51  ;;  %2128 = vmatpush1.bf16.msra.mxu1 %v4884_v52  ;;  %v396_v51 = vld [vmem:[%s7317_s2 + $0x248] sm:$0xff] }
  0xaa   : > { %2086 = vmatprep.subr.bf16.mxu0 %v4875_v54  ;;  %2129 = vmatprep.subr.bf16.mxu1 %v4877_v55  ;;  %v400_v52 = vld [vmem:[%s7317_s2 + $0x268] sm:$0xff]  ;;  %v4954_v54 = vcombine.low %v403_v41, %v407_v42  ;;  %v4956_v55 = vcombine.low %v404_v43, %v408_v44  ;;  %v4918_v41 = vcombine.low %v365_v26, %v369_v27 }
  0xab   : > { %v4949_v59 = vcombine.high %v396_v51, %v400_v52 }
  0xad   : > { %2087 = vmatpush1.bf16.msra.mxu0 %v4874_v0  ;;  %2130 = vmatpush1.bf16.msra.mxu1 %v4876_v1  ;;  %v388_v0 = vld [vmem:[%s7317_s2 + $0x208] sm:$0xff] }
  0xae   : > { %2088 = vmatprep.subr.bf16.mxu0 %v4995_v3  ;;  %2131 = vmatprep.subr.bf16.mxu1 %v4997_v6  ;;  %v392_v1 = vld [vmem:[%s7317_s2 + $0x228] sm:$0xff]  ;;  %v4946_v3 = vcombine.low %v395_v49, %v399_v50  ;;  %v4948_v6 = vcombine.low %v396_v51, %v400_v52 }
  0xaf   : > { %v4941_v8 = vcombine.high %v388_v0, %v392_v1 }
  0xb1   : > { %2089 = vmatpush2.bf16.msra.mxu0 %v4994_v56  ;;  %2132 = vmatpush2.bf16.msra.mxu1 %v4996_v11  ;;  %v382_v56 = vld [vmem:[%s7317_s2 + $0x1d8] sm:$0xff] }
  0xb2   : > { %2090 = vmatprep.subr.bf16.mxu0 %v4987_v12  ;;  %2133 = vmatprep.subr.bf16.mxu1 %v4989_v14  ;;  %v386_v11 = vld [vmem:[%s7317_s2 + $0x1f8] sm:$0xff]  ;;  %v4938_v12 = vcombine.low %v387_v17, %v391_v61  ;;  %v4940_v14 = vcombine.low %v388_v0, %v392_v1 }
  0xb3   : > { %v4937_v16 = vcombine.high %v382_v56, %v386_v11 }
  0xb5   : > { %2091 = vmatpush2.bf16.msra.mxu0 %v4986_v20  ;;  %2134 = vmatpush2.bf16.msra.mxu1 %v4988_v21  ;;  %v374_v20 = vld [vmem:[%s7317_s2 + $0x198] sm:$0xff] }
  0xb6   : > { %2092 = vmatprep.subr.bf16.mxu0 %v4979_v22  ;;  %2135 = vmatprep.subr.bf16.mxu1 %v4981_v23  ;;  %v378_v21 = vld [vmem:[%s7317_s2 + $0x1b8] sm:$0xff]  ;;  %v4934_v22 = vcombine.low %v381_v9, %v385_v10  ;;  %v4936_v23 = vcombine.low %v382_v56, %v386_v11 }
  0xb7   : > { %v4929_v25 = vcombine.high %v374_v20, %v378_v21  ;;  %v4928_v32 = vcombine.low %v374_v20, %v378_v21 }
  0xb9   : > { %2093 = vmatpush2.bf16.msra.mxu0 %v4978_v28  ;;  %2136 = vmatpush2.bf16.msra.mxu1 %v4980_v29  ;;  %v6166_v28 = vld [vmem:[%s5588_s9] ss:$8 sps:$4 sm:$0xff]   ;;  %v366_v29 = vld [vmem:[%s7317_s2 + $0x158] sm:$0xff] }
  0xba   : > { %2094 = vmatprep.subr.bf16.mxu0 %v4971_v30  ;;  %2137 = vmatprep.subr.bf16.mxu1 %v4973_v31  ;;  %v370_v30 = vld [vmem:[%s7317_s2 + $0x178] sm:$0xff]  ;;  %v4926_v31 = vcombine.low %v373_v18, %v377_v19 }
  0xbb   : > { %v4921_v35 = vcombine.high %v366_v29, %v370_v30  ;;  %v4920_v42 = vcombine.low %v366_v29, %v370_v30 }
  0xbd   : > { %2095 = vmatpush2.bf16.msra.mxu0 %v4970_v37  ;;  %2138 = vmatpush2.bf16.msra.mxu1 %v4972_v38  ;;  %v361_v37 = vld [vmem:[%s7317_s2 + $0x130] sm:$0xff]  ;;  %v6183_v38 = vld [vmem:[%s5588_s9 + $0x4] ss:$8 sps:$4 sm:$0xff]  }
  0xbe   : > { %2096 = vmatprep.subr.bf16.mxu0 %v4963_v39  ;;  %2139 = vmatprep.subr.bf16.mxu1 %v4965_v40  ;;  %v358_v39 = vld [vmem:[%s7317_s2 + $0x118] sm:$0xff]  ;;  %v4911_v43 = vcombine.high %v357_v36, %v361_v37  ;;  %v4910_v49 = vcombine.low %v357_v36, %v361_v37 }
  0xbf   : > { %v362_v40 = vld [vmem:[%s7317_s2 + $0x138] sm:$0xff] }
  0xc0   : > { %v4913_v44 = vcombine.high %v358_v39, %v362_v40  ;;  %v4912_v50 = vcombine.low %v358_v39, %v362_v40 }
  0xc1   : > { %2097 = vmatpush2.bf16.msra.mxu0 %v4962_v45  ;;  %2140 = vmatpush2.bf16.msra.mxu1 %v4964_v46  ;;  %v349_v45 = vld [vmem:[%s7317_s2 + $0xd0] sm:$0xff] }
  0xc2   : > { %2098 = vmatprep.subr.bf16.mxu0 %v4955_v47  ;;  %2141 = vmatprep.subr.bf16.mxu1 %v4957_v48  ;;  %v353_v46 = vld [vmem:[%s7317_s2 + $0xf0] sm:$0xff]  ;;  %v350_v47 = vld [vmem:[%s7317_s2 + $0xd8] sm:$0xff] }
  0xc3   : > { %v354_v48 = vld [vmem:[%s7317_s2 + $0xf8] sm:$0xff]  ;;  %v4903_v51 = vcombine.high %v349_v45, %v353_v46  ;;  %v4902_v17 = vcombine.low %v349_v45, %v353_v46 }
  0xc4   : > { %v4905_v52 = vcombine.high %v350_v47, %v354_v48  ;;  %v4904_v61 = vcombine.low %v350_v47, %v354_v48 }
  0xc5   : > { %2099 = vmatpush2.bf16.msra.mxu0 %v4954_v54  ;;  %2142 = vmatpush2.bf16.msra.mxu1 %v4956_v55  ;;  %v341_v54 = vld [vmem:[%s7317_s2 + $0x90] sm:$0xff] }
  0xc6   : > { %2100 = vmatprep.subr.bf16.mxu0 %v4947_v58  ;;  %2143 = vmatprep.subr.bf16.mxu1 %v4949_v59  ;;  %v345_v55 = vld [vmem:[%s7317_s2 + $0xb0] sm:$0xff]  ;;  %v342_v58 = vld [vmem:[%s7317_s2 + $0x98] sm:$0xff] }
  0xc7   : > { %v346_v59 = vld [vmem:[%s7317_s2 + $0xb8] sm:$0xff]  ;;  %v4895_v0 = vcombine.high %v341_v54, %v345_v55  ;;  %v4894_v9 = vcombine.low %v341_v54, %v345_v55 }
  0xc8   : > { %v4897_v1 = vcombine.high %v342_v58, %v346_v59  ;;  %v4896_v10 = vcombine.low %v342_v58, %v346_v59 }
  0xc9   : > { %2101 = vmatpush2.bf16.msra.mxu0 %v4946_v3  ;;  %2144 = vmatpush2.bf16.msra.mxu1 %v4948_v6  ;;  %v333_v3 = vld [vmem:[%s7317_s2 + $0x50] sm:$0xff] }
  0xca   : > { %2102 = vmatprep.subr.bf16.mxu0 %v4939_v7  ;;  %2145 = vmatprep.subr.bf16.mxu1 %v4941_v8  ;;  %v337_v6 = vld [vmem:[%s7317_s2 + $0x70] sm:$0xff]  ;;  %v334_v7 = vld [vmem:[%s7317_s2 + $0x58] sm:$0xff] }
  0xcb   : > { %v338_v8 = vld [vmem:[%s7317_s2 + $0x78] sm:$0xff]  ;;  %v4887_v56 = vcombine.high %v333_v3, %v337_v6  ;;  %v4886_v18 = vcombine.low %v333_v3, %v337_v6 }
  0xcc   : > { %v4889_v11 = vcombine.high %v334_v7, %v338_v8  ;;  %v4888_v19 = vcombine.low %v334_v7, %v338_v8 }
  0xcd   : > { %2103 = vmatpush2.bf16.msra.mxu0 %v4938_v12  ;;  %2146 = vmatpush2.bf16.msra.mxu1 %v4940_v14  ;;  %v325_v12 = vld [vmem:[%s7317_s2 + $0x10] sm:$0xff] }
  0xce   : > { %2158 = vmatprep.subr.bf16.mxu0 %v4935_v34  ;;  %2201 = vmatprep.subr.bf16.mxu1 %v4937_v16  ;;  %v329_v14 = vld [vmem:[%s7317_s2 + $0x30] sm:$0xff]  ;;  %v326_v34 = vld [vmem:[%s7317_s2 + $0x18] sm:$0xff] }
  0xcf   : > { %v330_v16 = vld [vmem:[%s7317_s2 + $0x38] sm:$0xff]  ;;  %v4879_v20 = vcombine.high %v325_v12, %v329_v14  ;;  %v4878_v26 = vcombine.low %v325_v12, %v329_v14 }
  0xd0   : > { %2105 = vmatmul.mubr.bf16.vlgmr.msra.gmra.mxu0 %v6166_v28  ;;  %2148 = vmatmul.mubr.bf16.vlgmr.msra.gmra.mxu1 %v6166_v28  ;;  %v4881_v21 = vcombine.high %v326_v34, %v330_v16  ;;  %v4880_v27 = vcombine.low %v326_v34, %v330_v16 }
  0xd1   : > { %2159 = vmatpush1.bf16.msra.mxu0 %v4934_v22  ;;  %2202 = vmatpush1.bf16.msra.mxu1 %v4936_v23  ;;  %v445_v22 = vld [vmem:[%s7317_s2 + $0x3d0] sm:$0xff] }
  0xd2   : > { %2160 = vmatprep.subr.bf16.mxu0 %v4927_v24  ;;  %2203 = vmatprep.subr.bf16.mxu1 %v4929_v25  ;;  %v449_v23 = vld [vmem:[%s7317_s2 + $0x3f0] sm:$0xff]  ;;  %v446_v24 = vld [vmem:[%s7317_s2 + $0x3d8] sm:$0xff] }
  0xd3   : > { %2190 = vmatprep.mubr.bf16.mxu0 %v6183_v38  ;;  %2233 = vmatprep.mubr.bf16.mxu1 %v6183_v38  ;;  %v450_v25 = vld [vmem:[%s7317_s2 + $0x3f8] sm:$0xff]  ;;  %v4999_v29 = vcombine.high %v445_v22, %v449_v23  ;;  %v4998_v36 = vcombine.low %v445_v22, %v449_v23 }
  0xd4   : > { %v5001_v30 = vcombine.high %v446_v24, %v450_v25  ;;  %v5000_v37 = vcombine.low %v446_v24, %v450_v25 }
  0xd5   : > { %2161 = vmatpush1.bf16.msra.mxu0 %v4926_v31  ;;  %2204 = vmatpush1.bf16.msra.mxu1 %v4928_v32  ;;  %v437_v31 = vld [vmem:[%s7317_s2 + $0x390] sm:$0xff] }
  0xd6   : > { %2162 = vmatprep.subr.bf16.mxu0 %v4919_v33  ;;  %2205 = vmatprep.subr.bf16.mxu1 %v4921_v35  ;;  %v441_v32 = vld [vmem:[%s7317_s2 + $0x3b0] sm:$0xff]  ;;  %v438_v33 = vld [vmem:[%s7317_s2 + $0x398] sm:$0xff] }
  0xd7   : > { %v442_v35 = vld [vmem:[%s7317_s2 + $0x3b8] sm:$0xff]  ;;  %v4991_v39 = vcombine.high %v437_v31, %v441_v32  ;;  %v4990_v45 = vcombine.low %v437_v31, %v441_v32 }
  0xd8   : > { %v4993_v40 = vcombine.high %v438_v33, %v442_v35  ;;  %v4992_v46 = vcombine.low %v438_v33, %v442_v35 }
  0xd9   : > { %2163 = vmatpush1.bf16.msra.mxu0 %v4918_v41  ;;  %2206 = vmatpush1.bf16.msra.mxu1 %v4920_v42  ;;  %v429_v41 = vld [vmem:[%s7317_s2 + $0x350] sm:$0xff] }
  0xda   : > { %2164 = vmatprep.subr.bf16.mxu0 %v4911_v43  ;;  %2207 = vmatprep.subr.bf16.mxu1 %v4913_v44  ;;  %v433_v42 = vld [vmem:[%s7317_s2 + $0x370] sm:$0xff]  ;;  %v430_v43 = vld [vmem:[%s7317_s2 + $0x358] sm:$0xff] }
  0xdb   : > { %v434_v44 = vld [vmem:[%s7317_s2 + $0x378] sm:$0xff]  ;;  %v4983_v47 = vcombine.high %v429_v41, %v433_v42  ;;  %v4982_v54 = vcombine.low %v429_v41, %v433_v42 }
  0xdc   : > { %v4985_v48 = vcombine.high %v430_v43, %v434_v44  ;;  %v4984_v55 = vcombine.low %v430_v43, %v434_v44 }
  0xdd   : > { %2165 = vmatpush1.bf16.msra.mxu0 %v4910_v49  ;;  %2208 = vmatpush1.bf16.msra.mxu1 %v4912_v50  ;;  %v421_v49 = vld [vmem:[%s7317_s2 + $0x310] sm:$0xff] }
  0xde   : > { %2166 = vmatprep.subr.bf16.mxu0 %v4903_v51  ;;  %2209 = vmatprep.subr.bf16.mxu1 %v4905_v52  ;;  %v425_v50 = vld [vmem:[%s7317_s2 + $0x330] sm:$0xff]  ;;  %v422_v51 = vld [vmem:[%s7317_s2 + $0x318] sm:$0xff] }
  0xdf   : > { %v426_v52 = vld [vmem:[%s7317_s2 + $0x338] sm:$0xff]  ;;  %v4975_v58 = vcombine.high %v421_v49, %v425_v50  ;;  %v4974_v3 = vcombine.low %v421_v49, %v425_v50  ;;  %v2380_v49 = vrot.slane %v6183_v38, 1  ;;  %v2381_v50 = vrot.slane %v5612_v60, 1  ;;  %v2285_v38 = vld [vmem:[%s7317_s2 + $0x948] sm:$0xff] }
  0xe0   : > { %v4977_v59 = vcombine.high %v422_v51, %v426_v52  ;;  %v4976_v6 = vcombine.low %v422_v51, %v426_v52 }
  0xe1   : > { %2167 = vmatpush1.bf16.msra.mxu0 %v4902_v17  ;;  %2210 = vmatpush1.bf16.msra.mxu1 %v4904_v61  ;;  %v413_v17 = vld [vmem:[%s7317_s2 + $0x2d0] sm:$0xff] }
  0xe2   : > { %2168 = vmatprep.subr.bf16.mxu0 %v4895_v0  ;;  %2211 = vmatprep.subr.bf16.mxu1 %v4897_v1  ;;  %v417_v61 = vld [vmem:[%s7317_s2 + $0x2f0] sm:$0xff]  ;;  %v414_v0 = vld [vmem:[%s7317_s2 + $0x2d8] sm:$0xff] }
  0xe3   : > { %v418_v1 = vld [vmem:[%s7317_s2 + $0x2f8] sm:$0xff]  ;;  %v4967_v7 = vcombine.high %v413_v17, %v417_v61  ;;  %v4966_v12 = vcombine.low %v413_v17, %v417_v61  ;;  %v2289_v17 = vld [vmem:[%s7317_s2 + $0x968] sm:$0xff]  ;;  %v6377_v61 = vsel %vm2376_vm1, %v2380_v49, %v2381_v50 }
  0xe4   : > { %v4969_v8 = vcombine.high %v414_v0, %v418_v1  ;;  %v4968_v14 = vcombine.low %v414_v0, %v418_v1 }
  0xe5   : > { %2169 = vmatpush1.bf16.msra.mxu0 %v4894_v9  ;;  %2212 = vmatpush1.bf16.msra.mxu1 %v4896_v10  ;;  %v405_v9 = vld [vmem:[%s7317_s2 + $0x290] sm:$0xff] }
  0xe6   : > { %2170 = vmatprep.subr.bf16.mxu0 %v4887_v56  ;;  %2213 = vmatprep.subr.bf16.mxu1 %v4889_v11  ;;  %v409_v10 = vld [vmem:[%s7317_s2 + $0x2b0] sm:$0xff]  ;;  %v406_v56 = vld [vmem:[%s7317_s2 + $0x298] sm:$0xff] }
  0xe7   : > { %v410_v11 = vld [vmem:[%s7317_s2 + $0x2b8] sm:$0xff]  ;;  %v4959_v34 = vcombine.high %v405_v9, %v409_v10  ;;  %v4958_v22 = vcombine.low %v405_v9, %v409_v10  ;;  %v2277_v9 = vld [vmem:[%s7317_s2 + $0x908] sm:$0xff] }
  0xe8   : > { %v4961_v16 = vcombine.high %v406_v56, %v410_v11  ;;  %v4960_v23 = vcombine.low %v406_v56, %v410_v11  ;;  %v2281_v10 = vld [vmem:[%s7317_s2 + $0x928] sm:$0xff]  ;;  %v5044_v11 = vcombine.low %v2285_v38, %v2289_v17 }
  0xe9   : > { %2171 = vmatpush1.bf16.msra.mxu0 %v4886_v18  ;;  %2214 = vmatpush1.bf16.msra.mxu1 %v4888_v19  ;;  %v397_v18 = vld [vmem:[%s7317_s2 + $0x250] sm:$0xff] }
  0xea   : > { %2172 = vmatprep.subr.bf16.mxu0 %v4879_v20  ;;  %2215 = vmatprep.subr.bf16.mxu1 %v4881_v21  ;;  %v401_v19 = vld [vmem:[%s7317_s2 + $0x270] sm:$0xff]  ;;  %v398_v20 = vld [vmem:[%s7317_s2 + $0x258] sm:$0xff] }
  0xeb   : > { %v402_v21 = vld [vmem:[%s7317_s2 + $0x278] sm:$0xff]  ;;  %v4951_v24 = vcombine.high %v397_v18, %v401_v19  ;;  %v4950_v31 = vcombine.low %v397_v18, %v401_v19  ;;  %v2269_v18 = vld [vmem:[%s7317_s2 + $0x8c8] sm:$0xff] }
  0xec   : > { %v4953_v25 = vcombine.high %v398_v20, %v402_v21  ;;  %v4952_v32 = vcombine.low %v398_v20, %v402_v21  ;;  %v2273_v19 = vld [vmem:[%s7317_s2 + $0x8e8] sm:$0xff]  ;;  %v5036_v21 = vcombine.low %v2277_v9, %v2281_v10 }
  0xed   : > { %2173 = vmatpush1.bf16.msra.mxu0 %v4878_v26  ;;  %2216 = vmatpush1.bf16.msra.mxu1 %v4880_v27  ;;  %v389_v26 = vld [vmem:[%s7317_s2 + $0x210] sm:$0xff] }
  0xee   : > { %2174 = vmatprep.subr.bf16.mxu0 %v4999_v29  ;;  %2217 = vmatprep.subr.bf16.mxu1 %v5001_v30  ;;  %v393_v27 = vld [vmem:[%s7317_s2 + $0x230] sm:$0xff]  ;;  %v390_v29 = vld [vmem:[%s7317_s2 + $0x218] sm:$0xff] }
  0xef   : > { %v394_v30 = vld [vmem:[%s7317_s2 + $0x238] sm:$0xff]  ;;  %v4943_v33 = vcombine.high %v389_v26, %v393_v27  ;;  %v4942_v41 = vcombine.low %v389_v26, %v393_v27  ;;  %v2261_v26 = vld [vmem:[%s7317_s2 + $0x888] sm:$0xff] }
  0xf0   : > { %v4945_v35 = vcombine.high %v390_v29, %v394_v30  ;;  %v4944_v42 = vcombine.low %v390_v29, %v394_v30  ;;  %v2265_v27 = vld [vmem:[%s7317_s2 + $0x8a8] sm:$0xff]  ;;  %v5028_v30 = vcombine.low %v2269_v18, %v2273_v19 }
  0xf1   : > { %2175 = vmatpush2.bf16.msra.mxu0 %v4998_v36  ;;  %2218 = vmatpush2.bf16.msra.mxu1 %v5000_v37  ;;  %v2300_v36 = vld [vmem:[%s7317_s2 + $0x9c0] sm:$0xff] }
  0xf2   : > { %2176 = vmatprep.subr.bf16.mxu0 %v4991_v39  ;;  %2219 = vmatprep.subr.bf16.mxu1 %v4993_v40  ;;  %v2304_v37 = vld [vmem:[%s7317_s2 + $0x9e0] sm:$0xff]  ;;  %v2301_v39 = vld [vmem:[%s7317_s2 + $0x9c8] sm:$0xff] }
  0xf3   : > { %v2305_v40 = vld [vmem:[%s7317_s2 + $0x9e8] sm:$0xff]  ;;  %v5059_v43 = vcombine.high %v2300_v36, %v2304_v37  ;;  %v5058_v51 = vcombine.low %v2300_v36, %v2304_v37 }
  0xf4   : > { %v5061_v44 = vcombine.high %v2301_v39, %v2305_v40  ;;  %v5060_v52 = vcombine.low %v2301_v39, %v2305_v40  ;;  %v2253_v36 = vld [vmem:[%s7317_s2 + $0x848] sm:$0xff]  ;;  %v5020_v40 = vcombine.low %v2261_v26, %v2265_v27 }
  0xf5   : > { %2177 = vmatpush2.bf16.msra.mxu0 %v4990_v45  ;;  %2220 = vmatpush2.bf16.msra.mxu1 %v4992_v46  ;;  %v2292_v45 = vld [vmem:[%s7317_s2 + $0x980] sm:$0xff]  ;;  %v2257_v37 = vld [vmem:[%s7317_s2 + $0x868] sm:$0xff] }
  0xf6   : > { %2178 = vmatprep.subr.bf16.mxu0 %v4983_v47  ;;  %2221 = vmatprep.subr.bf16.mxu1 %v4985_v48  ;;  %v2296_v46 = vld [vmem:[%s7317_s2 + $0x9a0] sm:$0xff]  ;;  %v2293_v47 = vld [vmem:[%s7317_s2 + $0x988] sm:$0xff] }
  0xf7   : > { %v2297_v48 = vld [vmem:[%s7317_s2 + $0x9a8] sm:$0xff]  ;;  %v5050_v0 = vcombine.low %v2292_v45, %v2296_v46 }
  0xf8   : > { %v5052_v1 = vcombine.low %v2293_v47, %v2297_v48 }
  0xf9   : > { %2179 = vmatpush2.bf16.msra.mxu0 %v4982_v54  ;;  %2222 = vmatpush2.bf16.msra.mxu1 %v4984_v55  ;;  %v5051_v54 = vcombine.high %v2292_v45, %v2296_v46  ;;  %v5053_v55 = vcombine.high %v2293_v47, %v2297_v48  ;;  %v2245_v45 = vld [vmem:[%s7317_s2 + $0x808] sm:$0xff]  ;;  %v5012_v48 = vcombine.low %v2253_v36, %v2257_v37 }
  0xfa   : > { %2180 = vmatprep.subr.bf16.mxu0 %v4975_v58  ;;  %2223 = vmatprep.subr.bf16.mxu1 %v4977_v59  ;;  %v2284_v58 = vld [vmem:[%s7317_s2 + $0x940] sm:$0xff]  ;;  %v2249_v46 = vld [vmem:[%s7317_s2 + $0x828] sm:$0xff] }
  0xfb   : > { %v2288_v59 = vld [vmem:[%s7317_s2 + $0x960] sm:$0xff]  ;;  %v5005_v50 = vcombine.high %v2245_v45, %v2249_v46 }
  0xfc   : > { %v5042_v56 = vcombine.low %v2284_v58, %v2288_v59 }
  0xfd   : > { %2181 = vmatpush2.bf16.msra.mxu0 %v4974_v3  ;;  %2224 = vmatpush2.bf16.msra.mxu1 %v4976_v6  ;;  %v5043_v3 = vcombine.high %v2284_v58, %v2288_v59  ;;  %v5045_v6 = vcombine.high %v2285_v38, %v2289_v17  ;;  %v5004_v59 = vcombine.low %v2245_v45, %v2249_v46 }
  0xfe   : > { %2182 = vmatprep.subr.bf16.mxu0 %v4967_v7  ;;  %2225 = vmatprep.subr.bf16.mxu1 %v4969_v8  ;;  %v2276_v7 = vld [vmem:[%s7317_s2 + $0x900] sm:$0xff] }
  0xff   : > { %v2280_v8 = vld [vmem:[%s7317_s2 + $0x920] sm:$0xff] }
 0x100   : > { %v5034_v20 = vcombine.low %v2276_v7, %v2280_v8 }
 0x101   : > { %2183 = vmatpush2.bf16.msra.mxu0 %v4966_v12  ;;  %2226 = vmatpush2.bf16.msra.mxu1 %v4968_v14  ;;  %v5035_v12 = vcombine.high %v2276_v7, %v2280_v8  ;;  %v5037_v14 = vcombine.high %v2277_v9, %v2281_v10 }
 0x102   : > { %2184 = vmatprep.subr.bf16.mxu0 %v4959_v34  ;;  %2227 = vmatprep.subr.bf16.mxu1 %v4961_v16  ;;  %v2268_v34 = vld [vmem:[%s7317_s2 + $0x8c0] sm:$0xff] }
 0x103   : > { %v2272_v16 = vld [vmem:[%s7317_s2 + $0x8e0] sm:$0xff] }
 0x104   : > { %v5026_v29 = vcombine.low %v2268_v34, %v2272_v16 }
 0x105   : > { %2185 = vmatpush2.bf16.msra.mxu0 %v4958_v22  ;;  %2228 = vmatpush2.bf16.msra.mxu1 %v4960_v23  ;;  %v5027_v22 = vcombine.high %v2268_v34, %v2272_v16  ;;  %v5029_v23 = vcombine.high %v2269_v18, %v2273_v19 }
 0x106   : > { %2186 = vmatprep.subr.bf16.mxu0 %v4951_v24  ;;  %2229 = vmatprep.subr.bf16.mxu1 %v4953_v25  ;;  %v2260_v24 = vld [vmem:[%s7317_s2 + $0x880] sm:$0xff] }
 0x107   : > { %v2264_v25 = vld [vmem:[%s7317_s2 + $0x8a0] sm:$0xff] }
 0x108   : > { %v5018_v39 = vcombine.low %v2260_v24, %v2264_v25 }
 0x109   : > { %2187 = vmatpush2.bf16.msra.mxu0 %v4950_v31  ;;  %2230 = vmatpush2.bf16.msra.mxu1 %v4952_v32  ;;  %v5019_v31 = vcombine.high %v2260_v24, %v2264_v25  ;;  %v5021_v32 = vcombine.high %v2261_v26, %v2265_v27 }
 0x10a   : > { %2188 = vmatprep.subr.bf16.mxu0 %v4943_v33  ;;  %2231 = vmatprep.subr.bf16.mxu1 %v4945_v35  ;;  %v2252_v33 = vld [vmem:[%s7317_s2 + $0x840] sm:$0xff] }
 0x10b   : > { %v2256_v35 = vld [vmem:[%s7317_s2 + $0x860] sm:$0xff] }
 0x10c   : > { %v5010_v47 = vcombine.low %v2252_v33, %v2256_v35 }
 0x10d   : > { %2189 = vmatpush2.bf16.msra.mxu0 %v4942_v41  ;;  %2232 = vmatpush2.bf16.msra.mxu1 %v4944_v42  ;;  %v5011_v41 = vcombine.high %v2252_v33, %v2256_v35  ;;  %v5013_v42 = vcombine.high %v2253_v36, %v2257_v37 }
 0x10e   : > { %3025 = vmatprep.subr.bf16.mxu0 %v5059_v43  ;;  %3068 = vmatprep.subr.bf16.mxu1 %v5061_v44  ;;  %v2244_v43 = vld [vmem:[%s7317_s2 + $0x800] sm:$0xff] }
 0x10f   : > { %v2248_v44 = vld [vmem:[%s7317_s2 + $0x820] sm:$0xff] }
 0x110   : > { %2191 = vmatmul.mubr.bf16.vlgmr.msra.gmra.mxu0 %v6166_v28  ;;  %2234 = vmatmul.mubr.bf16.vlgmr.msra.gmra.mxu1 %v6166_v28  ;;  %v5003_v49 = vcombine.high %v2244_v43, %v2248_v44  ;;  %v5002_v58 = vcombine.low %v2244_v43, %v2248_v44 }
 0x111   : > { %3026 = vmatpush1.bf16.msra.mxu0 %v5058_v51  ;;  %3069 = vmatpush1.bf16.msra.mxu1 %v5060_v52  ;;  %v2364_v51 = vld [vmem:[%s7317_s2 + $0xbc0] sm:$0xff] }
 0x112   : > { %3027 = vmatprep.subr.bf16.mxu0 %v5051_v54  ;;  %3070 = vmatprep.subr.bf16.mxu1 %v5053_v55  ;;  %v2368_v52 = vld [vmem:[%s7317_s2 + $0xbe0] sm:$0xff]  ;;  %v2365_v54 = vld [vmem:[%s7317_s2 + $0xbc8] sm:$0xff] }
 0x113   : > { %3057 = vmatprep.mubr.bf16.mxu0 %v6377_v61  ;;  %3100 = vmatprep.mubr.bf16.mxu1 %v6377_v61  ;;  %v2369_v55 = vld [vmem:[%s7317_s2 + $0xbe8] sm:$0xff]  ;;  %v5123_v38 = vcombine.high %v2364_v51, %v2368_v52  ;;  %v5122_v7 = vcombine.low %v2364_v51, %v2368_v52 }
 0x114   : > { %v5125_v17 = vcombine.high %v2365_v54, %v2369_v55  ;;  %v5124_v8 = vcombine.low %v2365_v54, %v2369_v55 }
 0x115   : > { %3028 = vmatpush1.bf16.msra.mxu0 %v5050_v0  ;;  %3071 = vmatpush1.bf16.msra.mxu1 %v5052_v1  ;;  %v2356_v0 = vld [vmem:[%s7317_s2 + $0xb80] sm:$0xff] }
 0x116   : > { %3029 = vmatprep.subr.bf16.mxu0 %v5043_v3  ;;  %3072 = vmatprep.subr.bf16.mxu1 %v5045_v6  ;;  %v2360_v1 = vld [vmem:[%s7317_s2 + $0xba0] sm:$0xff]  ;;  %v2357_v3 = vld [vmem:[%s7317_s2 + $0xb88] sm:$0xff] }
 0x117   : > { %v2361_v6 = vld [vmem:[%s7317_s2 + $0xba8] sm:$0xff]  ;;  %v5115_v9 = vcombine.high %v2356_v0, %v2360_v1  ;;  %v5114_v34 = vcombine.low %v2356_v0, %v2360_v1 }
 0x118   : > { %v5117_v10 = vcombine.high %v2357_v3, %v2361_v6  ;;  %v5116_v16 = vcombine.low %v2357_v3, %v2361_v6 }
 0x119   : > { %3030 = vmatpush1.bf16.msra.mxu0 %v5042_v56  ;;  %3073 = vmatpush1.bf16.msra.mxu1 %v5044_v11  ;;  %v2348_v56 = vld [vmem:[%s7317_s2 + $0xb40] sm:$0xff] }
 0x11a   : > { %3031 = vmatprep.subr.bf16.mxu0 %v5035_v12  ;;  %3074 = vmatprep.subr.bf16.mxu1 %v5037_v14  ;;  %v2352_v11 = vld [vmem:[%s7317_s2 + $0xb60] sm:$0xff]  ;;  %v2349_v12 = vld [vmem:[%s7317_s2 + $0xb48] sm:$0xff] }
 0x11b   : > { %v2353_v14 = vld [vmem:[%s7317_s2 + $0xb68] sm:$0xff]  ;;  %v5107_v18 = vcombine.high %v2348_v56, %v2352_v11  ;;  %v5106_v24 = vcombine.low %v2348_v56, %v2352_v11  ;;  %v2377_v11 = vrot.slane %v6166_v28, 1  ;;  %v2295_v28 = vld [vmem:[%s7317_s2 + $0x998] sm:$0xff] }
 0x11c   : > { %v5109_v19 = vcombine.high %v2349_v12, %v2353_v14  ;;  %v5108_v25 = vcombine.low %v2349_v12, %v2353_v14  ;;  %v2378_v12 = vrot.slane %v5717_v4, 1 }
 0x11d   : > { %3032 = vmatpush1.bf16.msra.mxu0 %v5034_v20  ;;  %3075 = vmatpush1.bf16.msra.mxu1 %v5036_v21  ;;  %v2340_v20 = vld [vmem:[%s7317_s2 + $0xb00] sm:$0xff] }
 0x11e   : > { %3033 = vmatprep.subr.bf16.mxu0 %v5027_v22  ;;  %3076 = vmatprep.subr.bf16.mxu1 %v5029_v23  ;;  %v2344_v21 = vld [vmem:[%s7317_s2 + $0xb20] sm:$0xff]  ;;  %v2341_v22 = vld [vmem:[%s7317_s2 + $0xb08] sm:$0xff] }
 0x11f   : > { %v2345_v23 = vld [vmem:[%s7317_s2 + $0xb28] sm:$0xff]  ;;  %v5099_v26 = vcombine.high %v2340_v20, %v2344_v21  ;;  %v5098_v33 = vcombine.low %v2340_v20, %v2344_v21  ;;  %v2299_v20 = vld [vmem:[%s7317_s2 + $0x9b8] sm:$0xff]  ;;  %v6565_v21 = vsel %vm2376_vm1, %v2377_v11, %v2378_v12  ;;  %v2246_v11 = vld [vmem:[%s7317_s2 + $0x810] sm:$0xff] }
 0x120   : > { %v5101_v27 = vcombine.high %v2341_v22, %v2345_v23  ;;  %v5100_v35 = vcombine.low %v2341_v22, %v2345_v23  ;;  %v2250_v12 = vld [vmem:[%s7317_s2 + $0x830] sm:$0xff] }
 0x121   : > { %3034 = vmatpush1.bf16.msra.mxu0 %v5026_v29  ;;  %3077 = vmatpush1.bf16.msra.mxu1 %v5028_v30  ;;  %v2332_v29 = vld [vmem:[%s7317_s2 + $0xac0] sm:$0xff] }
 0x122   : > { %3035 = vmatprep.subr.bf16.mxu0 %v5019_v31  ;;  %3078 = vmatprep.subr.bf16.mxu1 %v5021_v32  ;;  %v2336_v30 = vld [vmem:[%s7317_s2 + $0xae0] sm:$0xff]  ;;  %v2333_v31 = vld [vmem:[%s7317_s2 + $0xac8] sm:$0xff] }
 0x123   : > { %v2337_v32 = vld [vmem:[%s7317_s2 + $0xae8] sm:$0xff]  ;;  %v5091_v36 = vcombine.high %v2332_v29, %v2336_v30  ;;  %v5090_v43 = vcombine.low %v2332_v29, %v2336_v30  ;;  %v2287_v29 = vld [vmem:[%s7317_s2 + $0x958] sm:$0xff] }
 0x124   : > { %v5093_v37 = vcombine.high %v2333_v31, %v2337_v32  ;;  %v5092_v44 = vcombine.low %v2333_v31, %v2337_v32  ;;  %v2291_v30 = vld [vmem:[%s7317_s2 + $0x978] sm:$0xff]  ;;  %v5056_v32 = vcombine.low %v2295_v28, %v2299_v20 }
 0x125   : > { %3036 = vmatpush1.bf16.msra.mxu0 %v5018_v39  ;;  %3079 = vmatpush1.bf16.msra.mxu1 %v5020_v40  ;;  %v2324_v39 = vld [vmem:[%s7317_s2 + $0xa80] sm:$0xff] }
 0x126   : > { %3037 = vmatprep.subr.bf16.mxu0 %v5011_v41  ;;  %3080 = vmatprep.subr.bf16.mxu1 %v5013_v42  ;;  %v2328_v40 = vld [vmem:[%s7317_s2 + $0xaa0] sm:$0xff]  ;;  %v2325_v41 = vld [vmem:[%s7317_s2 + $0xa88] sm:$0xff] }
 0x127   : > { %v2329_v42 = vld [vmem:[%s7317_s2 + $0xaa8] sm:$0xff]  ;;  %v5083_v45 = vcombine.high %v2324_v39, %v2328_v40  ;;  %v5082_v51 = vcombine.low %v2324_v39, %v2328_v40  ;;  %v2279_v39 = vld [vmem:[%s7317_s2 + $0x918] sm:$0xff] }
 0x128   : > { %v5085_v46 = vcombine.high %v2325_v41, %v2329_v42  ;;  %v5084_v52 = vcombine.low %v2325_v41, %v2329_v42  ;;  %v2283_v40 = vld [vmem:[%s7317_s2 + $0x938] sm:$0xff]  ;;  %v5048_v42 = vcombine.low %v2287_v29, %v2291_v30 }
 0x129   : > { %3038 = vmatpush1.bf16.msra.mxu0 %v5010_v47  ;;  %3081 = vmatpush1.bf16.msra.mxu1 %v5012_v48  ;;  %v2316_v47 = vld [vmem:[%s7317_s2 + $0xa40] sm:$0xff] }
 0x12a   : > { %3039 = vmatprep.subr.bf16.mxu0 %v5003_v49  ;;  %3082 = vmatprep.subr.bf16.mxu1 %v5005_v50  ;;  %v2320_v48 = vld [vmem:[%s7317_s2 + $0xa60] sm:$0xff]  ;;  %v2317_v49 = vld [vmem:[%s7317_s2 + $0xa48] sm:$0xff] }
 0x12b   : > { %v2321_v50 = vld [vmem:[%s7317_s2 + $0xa68] sm:$0xff]  ;;  %v5075_v54 = vcombine.high %v2316_v47, %v2320_v48  ;;  %v5074_v0 = vcombine.low %v2316_v47, %v2320_v48  ;;  %v2275_v47 = vld [vmem:[%s7317_s2 + $0x8f8] sm:$0xff] }
 0x12c   : > { %v5077_v55 = vcombine.high %v2317_v49, %v2321_v50  ;;  %v5076_v1 = vcombine.low %v2317_v49, %v2321_v50  ;;  %v5040_v49 = vcombine.low %v2279_v39, %v2283_v40 }
 0x12d   : > { %3040 = vmatpush1.bf16.msra.mxu0 %v5002_v58  ;;  %3083 = vmatpush1.bf16.msra.mxu1 %v5004_v59  ;;  %v2308_v58 = vld [vmem:[%s7317_s2 + $0xa00] sm:$0xff] }
 0x12e   : > { %3041 = vmatprep.subr.bf16.mxu0 %v5123_v38  ;;  %3084 = vmatprep.subr.bf16.mxu1 %v5125_v17  ;;  %v2312_v59 = vld [vmem:[%s7317_s2 + $0xa20] sm:$0xff]  ;;  %v2309_v38 = vld [vmem:[%s7317_s2 + $0xa08] sm:$0xff] }
 0x12f   : > { %v2313_v17 = vld [vmem:[%s7317_s2 + $0xa28] sm:$0xff]  ;;  %v5067_v3 = vcombine.high %v2308_v58, %v2312_v59  ;;  %v5066_v56 = vcombine.low %v2308_v58, %v2312_v59  ;;  %v2267_v58 = vld [vmem:[%s7317_s2 + $0x8b8] sm:$0xff] }
 0x130   : > { %v5069_v6 = vcombine.high %v2309_v38, %v2313_v17  ;;  %v5068_v14 = vcombine.low %v2309_v38, %v2313_v17 }
 0x131   : > { %3042 = vmatpush2.bf16.msra.mxu0 %v5122_v7  ;;  %3085 = vmatpush2.bf16.msra.mxu1 %v5124_v8  ;;  %v2302_v7 = vld [vmem:[%s7317_s2 + $0x9d0] sm:$0xff] }
 0x132   : > { %3043 = vmatprep.subr.bf16.mxu0 %v5115_v9  ;;  %3086 = vmatprep.subr.bf16.mxu1 %v5117_v10  ;;  %v2306_v8 = vld [vmem:[%s7317_s2 + $0x9f0] sm:$0xff]  ;;  %v2303_v9 = vld [vmem:[%s7317_s2 + $0x9d8] sm:$0xff] }
 0x133   : > { %v2307_v10 = vld [vmem:[%s7317_s2 + $0x9f8] sm:$0xff]  ;;  %v5062_v22 = vcombine.low %v2302_v7, %v2306_v8 }
 0x134   : > { %v5064_v23 = vcombine.low %v2303_v9, %v2307_v10 }
 0x135   : > { %3044 = vmatpush2.bf16.msra.mxu0 %v5114_v34  ;;  %3087 = vmatpush2.bf16.msra.mxu1 %v5116_v16  ;;  %v5063_v34 = vcombine.high %v2302_v7, %v2306_v8  ;;  %v5065_v16 = vcombine.high %v2303_v9, %v2307_v10  ;;  %v2259_v7 = vld [vmem:[%s7317_s2 + $0x878] sm:$0xff] }
 0x136   : > { %3045 = vmatprep.subr.bf16.mxu0 %v5107_v18  ;;  %3088 = vmatprep.subr.bf16.mxu1 %v5109_v19  ;;  %v2294_v18 = vld [vmem:[%s7317_s2 + $0x990] sm:$0xff] }
 0x137   : > { %v2298_v19 = vld [vmem:[%s7317_s2 + $0x9b0] sm:$0xff] }
 0x138   : > { %v5054_v31 = vcombine.low %v2294_v18, %v2298_v19 }
 0x139   : > { %3046 = vmatpush2.bf16.msra.mxu0 %v5106_v24  ;;  %3089 = vmatpush2.bf16.msra.mxu1 %v5108_v25  ;;  %v5055_v24 = vcombine.high %v2294_v18, %v2298_v19  ;;  %v5057_v25 = vcombine.high %v2295_v28, %v2299_v20  ;;  %v5007_v19 = vcombine.high %v2246_v11, %v2250_v12  ;;  %v2366_v20 = vld [vmem:[%s7317_s2 + $0xbd0] sm:$0xff] }
 0x13a   : > { %3047 = vmatprep.subr.bf16.mxu0 %v5099_v26  ;;  %3090 = vmatprep.subr.bf16.mxu1 %v5101_v27  ;;  %v2286_v26 = vld [vmem:[%s7317_s2 + $0x950] sm:$0xff] }
 0x13b   : > { %v2290_v27 = vld [vmem:[%s7317_s2 + $0x970] sm:$0xff] }
 0x13c   : > { %v5046_v41 = vcombine.low %v2286_v26, %v2290_v27 }
 0x13d   : > { %3048 = vmatpush2.bf16.msra.mxu0 %v5098_v33  ;;  %3091 = vmatpush2.bf16.msra.mxu1 %v5100_v35  ;;  %v5047_v33 = vcombine.high %v2286_v26, %v2290_v27  ;;  %v5049_v35 = vcombine.high %v2287_v29, %v2291_v30  ;;  %v2358_v30 = vld [vmem:[%s7317_s2 + $0xb90] sm:$0xff] }
 0x13e   : > { %3049 = vmatprep.subr.bf16.mxu0 %v5091_v36  ;;  %3092 = vmatprep.subr.bf16.mxu1 %v5093_v37  ;;  %v2278_v36 = vld [vmem:[%s7317_s2 + $0x910] sm:$0xff] }
 0x13f   : > { %v2282_v37 = vld [vmem:[%s7317_s2 + $0x930] sm:$0xff] }
 0x140   : > { %v5038_v48 = vcombine.low %v2278_v36, %v2282_v37 }
 0x141   : > { %3050 = vmatpush2.bf16.msra.mxu0 %v5090_v43  ;;  %3093 = vmatpush2.bf16.msra.mxu1 %v5092_v44  ;;  %v5039_v43 = vcombine.high %v2278_v36, %v2282_v37  ;;  %v5041_v44 = vcombine.high %v2279_v39, %v2283_v40  ;;  %v2350_v40 = vld [vmem:[%s7317_s2 + $0xb50] sm:$0xff] }
 0x142   : > { %3051 = vmatprep.subr.bf16.mxu0 %v5083_v45  ;;  %3094 = vmatprep.subr.bf16.mxu1 %v5085_v46  ;;  %v2270_v45 = vld [vmem:[%s7317_s2 + $0x8d0] sm:$0xff] }
 0x143   : > { %v2274_v46 = vld [vmem:[%s7317_s2 + $0x8f0] sm:$0xff] }
 0x144   : > { %v5031_v50 = vcombine.high %v2270_v45, %v2274_v46  ;;  %v5030_v59 = vcombine.low %v2270_v45, %v2274_v46 }
 0x145   : > { %3052 = vmatpush2.bf16.msra.mxu0 %v5082_v51  ;;  %3095 = vmatpush2.bf16.msra.mxu1 %v5084_v52  ;;  %v2262_v52 = vld [vmem:[%s7317_s2 + $0x890] sm:$0xff] }
 0x146   : > { %3053 = vmatprep.subr.bf16.mxu0 %v5075_v54  ;;  %3096 = vmatprep.subr.bf16.mxu1 %v5077_v55  ;;  %v2266_v54 = vld [vmem:[%s7317_s2 + $0x8b0] sm:$0xff]  ;;  %v2263_v55 = vld [vmem:[%s7317_s2 + $0x898] sm:$0xff] }
 0x147   : > { %v5023_v17 = vcombine.high %v2262_v52, %v2266_v54  ;;  %v5022_v8 = vcombine.low %v2262_v52, %v2266_v54  ;;  %v5024_v9 = vcombine.low %v2263_v55, %v2267_v58 }
 0x149   : > { %3054 = vmatpush2.bf16.msra.mxu0 %v5074_v0  ;;  %3097 = vmatpush2.bf16.msra.mxu1 %v5076_v1  ;;  %v5025_v0 = vcombine.high %v2263_v55, %v2267_v58  ;;  %v2254_v1 = vld [vmem:[%s7317_s2 + $0x850] sm:$0xff] }
 0x14a   : > { %3055 = vmatprep.subr.bf16.mxu0 %v5067_v3  ;;  %3098 = vmatprep.subr.bf16.mxu1 %v5069_v6  ;;  %v2258_v3 = vld [vmem:[%s7317_s2 + $0x870] sm:$0xff]  ;;  %v2255_v6 = vld [vmem:[%s7317_s2 + $0x858] sm:$0xff] }
 0x14b   : > { %v5015_v10 = vcombine.high %v2254_v1, %v2258_v3  ;;  %v5016_v18 = vcombine.low %v2255_v6, %v2259_v7  ;;  %v2334_v58 = vld [vmem:[%s7317_s2 + $0xad0] sm:$0xff] }
 0x14d   : > { %3056 = vmatpush2.bf16.msra.mxu0 %v5066_v56  ;;  %3099 = vmatpush2.bf16.msra.mxu1 %v5068_v14  ;;  %v5017_v56 = vcombine.high %v2255_v6, %v2259_v7  ;;  %v2247_v14 = vld [vmem:[%s7317_s2 + $0x818] sm:$0xff]  ;;  %v2326_v7 = vld [vmem:[%s7317_s2 + $0xa90] sm:$0xff] }
 0x14e   : > { %3111 = vmatprep.subr.bf16.mxu0 %v5063_v34  ;;  %3154 = vmatprep.subr.bf16.mxu1 %v5065_v16  ;;  %v2251_v34 = vld [vmem:[%s7317_s2 + $0x838] sm:$0xff]  ;;  %v5014_v16 = vcombine.low %v2254_v1, %v2258_v3 }
 0x14f   : > { %v5009_v28 = vcombine.high %v2247_v14, %v2251_v34  ;;  %v5008_v26 = vcombine.low %v2247_v14, %v2251_v34  ;;  %v2318_v34 = vld [vmem:[%s7317_s2 + $0xa50] sm:$0xff] }
 0x150   : > { %3058 = vmatmul.mubr.bf16.vlgmr.msra.gmra.mxu0 %v6565_v21  ;;  %3101 = vmatmul.mubr.bf16.vlgmr.msra.gmra.mxu1 %v6565_v21 }
 0x151   : > { %3112 = vmatpush1.bf16.msra.mxu0 %v5062_v22  ;;  %3155 = vmatpush1.bf16.msra.mxu1 %v5064_v23  ;;  %v2370_v22 = vld [vmem:[%s7317_s2 + $0xbf0] sm:$0xff]  ;;  %v2367_v23 = vld [vmem:[%s7317_s2 + $0xbd8] sm:$0xff] }
 0x152   : > { %3113 = vmatprep.subr.bf16.mxu0 %v5055_v24  ;;  %3156 = vmatprep.subr.bf16.mxu1 %v5057_v25  ;;  %v2371_v24 = vld [vmem:[%s7317_s2 + $0xbf8] sm:$0xff]  ;;  %v5006_v25 = vcombine.low %v2246_v11, %v2250_v12  ;;  %v5127_v27 = vcombine.high %v2366_v20, %v2370_v22 }
 0x153   : > { %3143 = vmatprep.mubr.bf16.mxu0 %v6377_v61  ;;  %3186 = vmatprep.mubr.bf16.mxu1 %v6377_v61  ;;  %v2271_v61 = vld [vmem:[%s7317_s2 + $0x8d8] sm:$0xff]  ;;  %v5129_v29 = vcombine.high %v2367_v23, %v2371_v24  ;;  %v5128_v36 = vcombine.low %v2367_v23, %v2371_v24  ;;  %v2310_v24 = vld [vmem:[%s7317_s2 + $0xa10] sm:$0xff] }
 0x154   : > { %v5033_v51 = vcombine.high %v2271_v61, %v2275_v47  ;;  %v5032_v38 = vcombine.low %v2271_v61, %v2275_v47  ;;  %v2342_v47 = vld [vmem:[%s7317_s2 + $0xb10] sm:$0xff] }
 0x155   : > { %3114 = vmatpush1.bf16.msra.mxu0 %v5054_v31  ;;  %3157 = vmatpush1.bf16.msra.mxu1 %v5056_v32  ;;  %v2362_v31 = vld [vmem:[%s7317_s2 + $0xbb0] sm:$0xff]  ;;  %v2359_v32 = vld [vmem:[%s7317_s2 + $0xb98] sm:$0xff] }
 0x156   : > { %3115 = vmatprep.subr.bf16.mxu0 %v5047_v33  ;;  %3158 = vmatprep.subr.bf16.mxu1 %v5049_v35  ;;  %v2363_v33 = vld [vmem:[%s7317_s2 + $0xbb8] sm:$0xff]  ;;  %v5126_v35 = vcombine.low %v2366_v20, %v2370_v22  ;;  %v5119_v37 = vcombine.high %v2358_v30, %v2362_v31 }
 0x157   : > { %v5121_v39 = vcombine.high %v2359_v32, %v2363_v33  ;;  %v5120_v45 = vcombine.low %v2359_v32, %v2363_v33 }
 0x159   : > { %3116 = vmatpush1.bf16.msra.mxu0 %v5046_v41  ;;  %3159 = vmatpush1.bf16.msra.mxu1 %v5048_v42  ;;  %v2354_v41 = vld [vmem:[%s7317_s2 + $0xb70] sm:$0xff]  ;;  %v2351_v42 = vld [vmem:[%s7317_s2 + $0xb58] sm:$0xff] }
 0x15a   : > { %3117 = vmatprep.subr.bf16.mxu0 %v5039_v43  ;;  %3160 = vmatprep.subr.bf16.mxu1 %v5041_v44  ;;  %v2355_v43 = vld [vmem:[%s7317_s2 + $0xb78] sm:$0xff]  ;;  %v5118_v44 = vcombine.low %v2358_v30, %v2362_v31  ;;  %v5111_v46 = vcombine.high %v2350_v40, %v2354_v41 }
 0x15b   : > { %v5113_v61 = vcombine.high %v2351_v42, %v2355_v43  ;;  %v5112_v52 = vcombine.low %v2351_v42, %v2355_v43  ;;  %v3357_v43 = vrot.slane %v604_v2, 2 }
 0x15d   : > { %3118 = vmatpush1.bf16.msra.mxu0 %v5038_v48  ;;  %3161 = vmatpush1.bf16.msra.mxu1 %v5040_v49  ;;  %v2346_v48 = vld [vmem:[%s7317_s2 + $0xb30] sm:$0xff]  ;;  %v2343_v49 = vld [vmem:[%s7317_s2 + $0xb18] sm:$0xff] }
 0x15e   : > { %3119 = vmatprep.subr.bf16.mxu0 %v5031_v50  ;;  %3162 = vmatprep.subr.bf16.mxu1 %v5033_v51  ;;  %v2347_v50 = vld [vmem:[%s7317_s2 + $0xb38] sm:$0xff]  ;;  %v5110_v51 = vcombine.low %v2350_v40, %v2354_v41  ;;  %v5103_v54 = vcombine.high %v2342_v47, %v2346_v48  ;;  %v3351_v40 = vrot.slane %v597_v62, 1  ;;  %v3352_v41 = vrot.slane %v599_v63, 2  ;;  %v3266_v62 = vld [vmem:[%s7317_s2 + $0xda8] sm:$0xff] }
 0x15f   : > { %v5105_v55 = vcombine.high %v2343_v49, %v2347_v50  ;;  %v5104_v1 = vcombine.low %v2343_v49, %v2347_v50 }
 0x160   : > { %v3353_v63 = vor.u32 %v3352_v41, %v3351_v40  ;;  %v3213_v40 = vld [vmem:[%s7317_s2 + $0xc00] sm:$0xff] }
 0x161   : > { %3120 = vmatpush1.bf16.msra.mxu0 %v5030_v59  ;;  %3163 = vmatpush1.bf16.msra.mxu1 %v5032_v38  ;;  %v2338_v59 = vld [vmem:[%s7317_s2 + $0xaf0] sm:$0xff]  ;;  %v2335_v38 = vld [vmem:[%s7317_s2 + $0xad8] sm:$0xff]  ;;  %v3217_v41 = vld [vmem:[%s7317_s2 + $0xc20] sm:$0xff] }
 0x162   : > { %3121 = vmatprep.subr.bf16.mxu0 %v5023_v17  ;;  %3164 = vmatprep.subr.bf16.mxu1 %v5025_v0  ;;  %v2339_v17 = vld [vmem:[%s7317_s2 + $0xaf8] sm:$0xff]  ;;  %v5102_v0 = vcombine.low %v2342_v47, %v2346_v48  ;;  %v5095_v3 = vcombine.high %v2334_v58, %v2338_v59  ;;  %v3261_v47 = vld [vmem:[%s7317_s2 + $0xd80] sm:$0xff] }
 0x163   : > { %v5097_v6 = vcombine.high %v2335_v38, %v2339_v17  ;;  %v5096_v11 = vcombine.low %v2335_v38, %v2339_v17  ;;  %v5179_v50 = vcombine.high %v3261_v47, %v3265_v57  ;;  %v5178_v38 = vcombine.low %v3261_v47, %v3265_v57  ;;  %v3333_v47 = vld [vmem:[%s7317_s2 + $0xfc0] sm:$0xff] }
 0x164   : > { %v3337_v57 = vld [vmem:[%s7317_s2 + $0xfe0] sm:$0xff] }
 0x165   : > { %3122 = vmatpush1.bf16.msra.mxu0 %v5022_v8  ;;  %3165 = vmatpush1.bf16.msra.mxu1 %v5024_v9  ;;  %v2330_v8 = vld [vmem:[%s7317_s2 + $0xab0] sm:$0xff]  ;;  %v2327_v9 = vld [vmem:[%s7317_s2 + $0xa98] sm:$0xff] }
 0x166   : > { %3123 = vmatprep.subr.bf16.mxu0 %v5015_v10  ;;  %3166 = vmatprep.subr.bf16.mxu1 %v5017_v56  ;;  %v2331_v10 = vld [vmem:[%s7317_s2 + $0xab8] sm:$0xff]  ;;  %v5094_v56 = vcombine.low %v2334_v58, %v2338_v59  ;;  %v5087_v12 = vcombine.high %v2326_v7, %v2330_v8  ;;  %v3258_v58 = vld [vmem:[%s7317_s2 + $0xd68] sm:$0xff] }
 0x167   : > { %v5089_v14 = vcombine.high %v2327_v9, %v2331_v10  ;;  %v5088_v20 = vcombine.low %v2327_v9, %v2331_v10 }
 0x169   : > { %3124 = vmatpush1.bf16.msra.mxu0 %v5014_v16  ;;  %3167 = vmatpush1.bf16.msra.mxu1 %v5016_v18  ;;  %v2322_v16 = vld [vmem:[%s7317_s2 + $0xa70] sm:$0xff]  ;;  %v2319_v18 = vld [vmem:[%s7317_s2 + $0xa58] sm:$0xff] }
 0x16a   : > { %3125 = vmatprep.subr.bf16.mxu0 %v5007_v19  ;;  %3168 = vmatprep.subr.bf16.mxu1 %v5009_v28  ;;  %v2323_v19 = vld [vmem:[%s7317_s2 + $0xa78] sm:$0xff]  ;;  %v5086_v28 = vcombine.low %v2326_v7, %v2330_v8  ;;  %v5079_v22 = vcombine.high %v2318_v34, %v2322_v16  ;;  %v5078_v30 = vcombine.low %v2318_v34, %v2322_v16  ;;  %v3250_v7 = vld [vmem:[%s7317_s2 + $0xd28] sm:$0xff] }
 0x16b   : > { %v5081_v23 = vcombine.high %v2319_v18, %v2323_v19  ;;  %v5080_v31 = vcombine.low %v2319_v18, %v2323_v19  ;;  %v3242_v34 = vld [vmem:[%s7317_s2 + $0xce8] sm:$0xff] }
 0x16d   : > { %3126 = vmatpush1.bf16.msra.mxu0 %v5006_v25  ;;  %3169 = vmatpush1.bf16.msra.mxu1 %v5008_v26  ;;  %v2314_v25 = vld [vmem:[%s7317_s2 + $0xa30] sm:$0xff]  ;;  %v2311_v26 = vld [vmem:[%s7317_s2 + $0xa18] sm:$0xff] }
 0x16e   : > { %3127 = vmatprep.subr.bf16.mxu0 %v5127_v27  ;;  %3170 = vmatprep.subr.bf16.mxu1 %v5129_v29  ;;  %v2315_v27 = vld [vmem:[%s7317_s2 + $0xa38] sm:$0xff]  ;;  %v3354_v29 = vshrl.u32 %v5612_v60, 16  ;;  %v5071_v32 = vcombine.high %v2310_v24, %v2314_v25  ;;  %v3262_v60 = vld [vmem:[%s7317_s2 + $0xd88] sm:$0xff] }
 0x16f   : > { %v5073_v33 = vcombine.high %v2311_v26, %v2315_v27  ;;  %v5180_v17 = vcombine.low %v3262_v60, %v3266_v62 }
 0x170   : > { %v3356_v42 = vrot.slane %v3354_v29, 1 }
 0x171   : > { %3128 = vmatpush2.bf16.msra.mxu0 %v5126_v35  ;;  %3171 = vmatpush2.bf16.msra.mxu1 %v5128_v36  ;;  %v3269_v35 = vld [vmem:[%s7317_s2 + $0xdc0] sm:$0xff] }
 0x172   : > { %3129 = vmatprep.subr.bf16.mxu0 %v5119_v37  ;;  %3172 = vmatprep.subr.bf16.mxu1 %v5121_v39  ;;  %v3273_v36 = vld [vmem:[%s7317_s2 + $0xde0] sm:$0xff]  ;;  %v3270_v37 = vld [vmem:[%s7317_s2 + $0xdc8] sm:$0xff]  ;;  %v3358_v2 = vor.u32 %v3357_v43, %v3356_v42 }
 0x173   : > { %v3274_v39 = vld [vmem:[%s7317_s2 + $0xde8] sm:$0xff]  ;;  %v5186_v48 = vcombine.low %v3269_v35, %v3273_v36 }
 0x174   : > { %v5188_v49 = vcombine.low %v3270_v37, %v3274_v39  ;;  %v6784_v59 = vsel %vm3341_vm2, %v3353_v63, %v3358_v2  ;;  %v3214_v42 = vld [vmem:[%s7317_s2 + $0xc08] sm:$0xff]  ;;  %v5130_v63 = vcombine.low %v3213_v40, %v3217_v41 }
 0x175   : > { %3130 = vmatpush2.bf16.msra.mxu0 %v5118_v44  ;;  %3173 = vmatpush2.bf16.msra.mxu1 %v5120_v45  ;;  %v5070_v44 = vcombine.low %v2310_v24, %v2314_v25  ;;  %v5072_v45 = vcombine.low %v2311_v26, %v2315_v27  ;;  %v3234_v24 = vld [vmem:[%s7317_s2 + $0xca8] sm:$0xff] }
 0x176   : > { %3131 = vmatprep.subr.bf16.mxu0 %v5111_v46  ;;  %3174 = vmatprep.subr.bf16.mxu1 %v5113_v61  ;;  %v5187_v46 = vcombine.high %v3269_v35, %v3273_v36  ;;  %v5189_v61 = vcombine.high %v3270_v37, %v3274_v39  ;;  %v3218_v43 = vld [vmem:[%s7317_s2 + $0xc28] sm:$0xff] }
 0x177   : > { %v5132_v2 = vcombine.low %v3214_v42, %v3218_v43 }
 0x179   : > { %3132 = vmatpush2.bf16.msra.mxu0 %v5110_v51  ;;  %3175 = vmatpush2.bf16.msra.mxu1 %v5112_v52  ;;  %v5181_v51 = vcombine.high %v3262_v60, %v3266_v62  ;;  %v3253_v52 = vld [vmem:[%s7317_s2 + $0xd40] sm:$0xff]  ;;  %v3334_v60 = vld [vmem:[%s7317_s2 + $0xfc8] sm:$0xff] }
 0x17a   : > { %3133 = vmatprep.subr.bf16.mxu0 %v5103_v54  ;;  %3176 = vmatprep.subr.bf16.mxu1 %v5105_v55  ;;  %v3257_v54 = vld [vmem:[%s7317_s2 + $0xd60] sm:$0xff]  ;;  %v3254_v55 = vld [vmem:[%s7317_s2 + $0xd48] sm:$0xff] }
 0x17b   : > { %v5170_v8 = vcombine.low %v3253_v52, %v3257_v54  ;;  %v5172_v9 = vcombine.low %v3254_v55, %v3258_v58  ;;  %v3338_v62 = vld [vmem:[%s7317_s2 + $0xfe8] sm:$0xff] }
 0x17d   : > { %3134 = vmatpush2.bf16.msra.mxu0 %v5102_v0  ;;  %3177 = vmatpush2.bf16.msra.mxu1 %v5104_v1  ;;  %v5171_v0 = vcombine.high %v3253_v52, %v3257_v54  ;;  %v5173_v1 = vcombine.high %v3254_v55, %v3258_v58  ;;  %v3326_v52 = vld [vmem:[%s7317_s2 + $0xf88] sm:$0xff]  ;;  %v5250_v55 = vcombine.low %v3333_v47, %v3337_v57 }
 0x17e   : > { %3135 = vmatprep.subr.bf16.mxu0 %v5095_v3  ;;  %3178 = vmatprep.subr.bf16.mxu1 %v5097_v6  ;;  %v3245_v3 = vld [vmem:[%s7317_s2 + $0xd00] sm:$0xff]  ;;  %v3330_v54 = vld [vmem:[%s7317_s2 + $0xfa8] sm:$0xff]  ;;  %v5252_v58 = vcombine.low %v3334_v60, %v3338_v62 }
 0x17f   : > { %v3249_v6 = vld [vmem:[%s7317_s2 + $0xd20] sm:$0xff] }
 0x180   : > { %v5163_v10 = vcombine.high %v3245_v3, %v3249_v6  ;;  %v5162_v16 = vcombine.low %v3245_v3, %v3249_v6  ;;  %v3318_v3 = vld [vmem:[%s7317_s2 + $0xf48] sm:$0xff] }
 0x181   : > { %3136 = vmatpush2.bf16.msra.mxu0 %v5094_v56  ;;  %3179 = vmatpush2.bf16.msra.mxu1 %v5096_v11  ;;  %v3237_v11 = vld [vmem:[%s7317_s2 + $0xcc0] sm:$0xff]  ;;  %v3322_v6 = vld [vmem:[%s7317_s2 + $0xf68] sm:$0xff] }
 0x182   : > { %3137 = vmatprep.subr.bf16.mxu0 %v5087_v12  ;;  %3180 = vmatprep.subr.bf16.mxu1 %v5089_v14  ;;  %v3241_v12 = vld [vmem:[%s7317_s2 + $0xce0] sm:$0xff]  ;;  %v3238_v14 = vld [vmem:[%s7317_s2 + $0xcc8] sm:$0xff] }
 0x183   : > { %v5155_v19 = vcombine.high %v3237_v11, %v3241_v12  ;;  %v5154_v25 = vcombine.low %v3237_v11, %v3241_v12  ;;  %v5156_v26 = vcombine.low %v3238_v14, %v3242_v34  ;;  %v3310_v11 = vld [vmem:[%s7317_s2 + $0xf08] sm:$0xff] }
 0x184   : > { %v3314_v12 = vld [vmem:[%s7317_s2 + $0xf28] sm:$0xff] }
 0x185   : > { %3138 = vmatpush2.bf16.msra.mxu0 %v5086_v28  ;;  %3181 = vmatpush2.bf16.msra.mxu1 %v5088_v20  ;;  %v5157_v28 = vcombine.high %v3238_v14, %v3242_v34  ;;  %v3229_v20 = vld [vmem:[%s7317_s2 + $0xc80] sm:$0xff]  ;;  %v5236_v34 = vcombine.low %v3318_v3, %v3322_v6 }
 0x186   : > { %3139 = vmatprep.subr.bf16.mxu0 %v5079_v22  ;;  %3182 = vmatprep.subr.bf16.mxu1 %v5081_v23  ;;  %v3233_v22 = vld [vmem:[%s7317_s2 + $0xca0] sm:$0xff]  ;;  %v3230_v23 = vld [vmem:[%s7317_s2 + $0xc88] sm:$0xff] }
 0x187   : > { %v5147_v27 = vcombine.high %v3229_v20, %v3233_v22  ;;  %v5149_v29 = vcombine.high %v3230_v23, %v3234_v24  ;;  %v5146_v35 = vcombine.low %v3229_v20, %v3233_v22  ;;  %v5148_v36 = vcombine.low %v3230_v23, %v3234_v24  ;;  %v3302_v20 = vld [vmem:[%s7317_s2 + $0xec8] sm:$0xff] }
 0x188   : > { %v3306_v22 = vld [vmem:[%s7317_s2 + $0xee8] sm:$0xff]  ;;  %v5228_v24 = vcombine.low %v3310_v11, %v3314_v12 }
 0x189   : > { %3140 = vmatpush2.bf16.msra.mxu0 %v5078_v30  ;;  %3183 = vmatpush2.bf16.msra.mxu1 %v5080_v31  ;;  %v3221_v30 = vld [vmem:[%s7317_s2 + $0xc40] sm:$0xff] }
 0x18a   : > { %3141 = vmatprep.subr.bf16.mxu0 %v5071_v32  ;;  %3184 = vmatprep.subr.bf16.mxu1 %v5073_v33  ;;  %v3225_v31 = vld [vmem:[%s7317_s2 + $0xc60] sm:$0xff]  ;;  %v3222_v32 = vld [vmem:[%s7317_s2 + $0xc48] sm:$0xff] }
 0x18b   : > { %v3226_v33 = vld [vmem:[%s7317_s2 + $0xc68] sm:$0xff]  ;;  %v5139_v37 = vcombine.high %v3221_v30, %v3225_v31 }
 0x18c   : > { %v5141_v39 = vcombine.high %v3222_v32, %v3226_v33 }
 0x18d   : > { %3142 = vmatpush2.bf16.msra.mxu0 %v5070_v44  ;;  %3185 = vmatpush2.bf16.msra.mxu1 %v5072_v45  ;;  %v5138_v44 = vcombine.low %v3221_v30, %v3225_v31  ;;  %v5140_v45 = vcombine.low %v3222_v32, %v3226_v33  ;;  %v3294_v30 = vld [vmem:[%s7317_s2 + $0xe88] sm:$0xff]  ;;  %v5220_v33 = vcombine.low %v3302_v20, %v3306_v22 }
 0x18e   : > { %4002 = vmatprep.subr.bf16.mxu0 %v5187_v46  ;;  %4045 = vmatprep.subr.bf16.mxu1 %v5189_v61  ;;  %v5131_v46 = vcombine.high %v3213_v40, %v3217_v41  ;;  %v5133_v61 = vcombine.high %v3214_v42, %v3218_v43  ;;  %v3298_v31 = vld [vmem:[%s7317_s2 + $0xea8] sm:$0xff]  ;;  %v3345_v43 = vshrl.u32 %v5717_v4, 16  ;;  %v3276_v4 = vld [vmem:[%s7317_s2 + $0xdf8] sm:$0xff] }
 0x18f   : > { %v3286_v40 = vld [vmem:[%s7317_s2 + $0xe48] sm:$0xff] }
 0x190   : > { %3144 = vmatmul.mubr.bf16.vlgmr.msra.gmra.mxu0 %v6565_v21  ;;  %3187 = vmatmul.mubr.bf16.vlgmr.msra.gmra.mxu1 %v6565_v21  ;;  %v3246_v21 = vld [vmem:[%s7317_s2 + $0xd08] sm:$0xff] }
 0x191   : > { %4003 = vmatpush1.bf16.msra.mxu0 %v5186_v48  ;;  %4046 = vmatpush1.bf16.msra.mxu1 %v5188_v49  ;;  %v5165_v56 = vcombine.high %v3246_v21, %v3250_v7  ;;  %v5164_v18 = vcombine.low %v3246_v21, %v3250_v7  ;;  %v5251_v48 = vcombine.high %v3333_v47, %v3337_v57  ;;  %v3290_v41 = vld [vmem:[%s7317_s2 + $0xe68] sm:$0xff]  ;;  %v3281_v47 = vld [vmem:[%s7317_s2 + $0xe20] sm:$0xff] }
 0x192   : > { %4004 = vmatprep.subr.bf16.mxu0 %v5179_v50  ;;  %4047 = vmatprep.subr.bf16.mxu1 %v5181_v51  ;;  %v5253_v49 = vcombine.high %v3334_v60, %v3338_v62  ;;  %v3325_v50 = vld [vmem:[%s7317_s2 + $0xf80] sm:$0xff]  ;;  %v5244_v7 = vcombine.low %v3326_v52, %v3330_v54  ;;  %v3278_v60 = vld [vmem:[%s7317_s2 + $0xe08] sm:$0xff] }
 0x193   : > { %4034 = vmatprep.mubr.bf16.mxu0 %v6784_v59  ;;  %4077 = vmatprep.mubr.bf16.mxu1 %v6784_v59  ;;  %v3329_v51 = vld [vmem:[%s7317_s2 + $0xfa0] sm:$0xff]  ;;  %v3282_v62 = vld [vmem:[%s7317_s2 + $0xe28] sm:$0xff] }
 0x194   : > { %v5242_v21 = vcombine.low %v3325_v50, %v3329_v51 }
 0x195   : > { %4005 = vmatpush1.bf16.msra.mxu0 %v5178_v38  ;;  %4048 = vmatpush1.bf16.msra.mxu1 %v5180_v17  ;;  %v5243_v38 = vcombine.high %v3325_v50, %v3329_v51  ;;  %v5245_v17 = vcombine.high %v3326_v52, %v3330_v54  ;;  %v5204_v50 = vcombine.low %v3286_v40, %v3290_v41  ;;  %v3271_v54 = vld [vmem:[%s7317_s2 + $0xdd0] sm:$0xff] }
 0x196   : > { %4006 = vmatprep.subr.bf16.mxu0 %v5171_v0  ;;  %4049 = vmatprep.subr.bf16.mxu1 %v5173_v1  ;;  %v3317_v0 = vld [vmem:[%s7317_s2 + $0xf40] sm:$0xff]  ;;  %v5197_v52 = vcombine.high %v3278_v60, %v3282_v62 }
 0x197   : > { %v3321_v1 = vld [vmem:[%s7317_s2 + $0xf60] sm:$0xff] }
 0x198   : > { %v5234_v14 = vcombine.low %v3317_v0, %v3321_v1 }
 0x199   : > { %4007 = vmatpush1.bf16.msra.mxu0 %v5170_v8  ;;  %4050 = vmatpush1.bf16.msra.mxu1 %v5172_v9  ;;  %v5235_v8 = vcombine.high %v3317_v0, %v3321_v1  ;;  %v5237_v9 = vcombine.high %v3318_v3, %v3322_v6  ;;  %v3263_v0 = vld [vmem:[%s7317_s2 + $0xd90] sm:$0xff]  ;;  %v3264_v3 = vld [vmem:[%s7317_s2 + $0xd98] sm:$0xff] }
 0x19a   : > { %4008 = vmatprep.subr.bf16.mxu0 %v5163_v10  ;;  %4051 = vmatprep.subr.bf16.mxu1 %v5165_v56  ;;  %v3309_v10 = vld [vmem:[%s7317_s2 + $0xf00] sm:$0xff]  ;;  %v3267_v1 = vld [vmem:[%s7317_s2 + $0xdb0] sm:$0xff]  ;;  %v3268_v6 = vld [vmem:[%s7317_s2 + $0xdb8] sm:$0xff] }
 0x19b   : > { %v3313_v56 = vld [vmem:[%s7317_s2 + $0xf20] sm:$0xff] }
 0x19c   : > { %v5226_v23 = vcombine.low %v3309_v10, %v3313_v56 }
 0x19d   : > { %4009 = vmatpush1.bf16.msra.mxu0 %v5162_v16  ;;  %4052 = vmatpush1.bf16.msra.mxu1 %v5164_v18  ;;  %v5227_v16 = vcombine.high %v3309_v10, %v3313_v56  ;;  %v5229_v18 = vcombine.high %v3310_v11, %v3314_v12  ;;  %v5185_v10 = vcombine.high %v3264_v3, %v3268_v6  ;;  %v3255_v56 = vld [vmem:[%s7317_s2 + $0xd50] sm:$0xff]  ;;  %v3256_v12 = vld [vmem:[%s7317_s2 + $0xd58] sm:$0xff] }
 0x19e   : > { %4010 = vmatprep.subr.bf16.mxu0 %v5155_v19  ;;  %4053 = vmatprep.subr.bf16.mxu1 %v5157_v28  ;;  %v3301_v19 = vld [vmem:[%s7317_s2 + $0xec0] sm:$0xff]  ;;  %v3259_v11 = vld [vmem:[%s7317_s2 + $0xd70] sm:$0xff] }
 0x19f   : > { %v3305_v28 = vld [vmem:[%s7317_s2 + $0xee0] sm:$0xff] }
 0x1a0   : > { %v5218_v32 = vcombine.low %v3301_v19, %v3305_v28 }
 0x1a1   : > { %4011 = vmatpush1.bf16.msra.mxu0 %v5154_v25  ;;  %4054 = vmatpush1.bf16.msra.mxu1 %v5156_v26  ;;  %v5219_v25 = vcombine.high %v3301_v19, %v3305_v28  ;;  %v5221_v26 = vcombine.high %v3302_v20, %v3306_v22  ;;  %v3247_v28 = vld [vmem:[%s7317_s2 + $0xd10] sm:$0xff]  ;;  %v3248_v22 = vld [vmem:[%s7317_s2 + $0xd18] sm:$0xff] }
 0x1a2   : > { %4012 = vmatprep.subr.bf16.mxu0 %v5147_v27  ;;  %4055 = vmatprep.subr.bf16.mxu1 %v5149_v29  ;;  %v3293_v27 = vld [vmem:[%s7317_s2 + $0xe80] sm:$0xff]  ;;  %v3251_v20 = vld [vmem:[%s7317_s2 + $0xd30] sm:$0xff] }
 0x1a3   : > { %v3297_v29 = vld [vmem:[%s7317_s2 + $0xea0] sm:$0xff] }
 0x1a4   : > { %v5210_v42 = vcombine.low %v3293_v27, %v3297_v29 }
 0x1a5   : > { %4013 = vmatpush1.bf16.msra.mxu0 %v5146_v35  ;;  %4056 = vmatpush1.bf16.msra.mxu1 %v5148_v36  ;;  %v5211_v35 = vcombine.high %v3293_v27, %v3297_v29  ;;  %v5213_v36 = vcombine.high %v3294_v30, %v3298_v31  ;;  %v3239_v29 = vld [vmem:[%s7317_s2 + $0xcd0] sm:$0xff] }
 0x1a6   : > { %4014 = vmatprep.subr.bf16.mxu0 %v5139_v37  ;;  %4057 = vmatprep.subr.bf16.mxu1 %v5141_v39  ;;  %v3285_v37 = vld [vmem:[%s7317_s2 + $0xe40] sm:$0xff] }
 0x1a7   : > { %v3289_v39 = vld [vmem:[%s7317_s2 + $0xe60] sm:$0xff] }
 0x1a8   : > { %v5202_v57 = vcombine.low %v3285_v37, %v3289_v39 }
 0x1a9   : > { %4015 = vmatpush1.bf16.msra.mxu0 %v5138_v44  ;;  %4058 = vmatpush1.bf16.msra.mxu1 %v5140_v45  ;;  %v5212_v44 = vcombine.low %v3294_v30, %v3298_v31  ;;  %v5203_v45 = vcombine.high %v3285_v37, %v3289_v39  ;;  %v3243_v30 = vld [vmem:[%s7317_s2 + $0xcf0] sm:$0xff]  ;;  %v3244_v31 = vld [vmem:[%s7317_s2 + $0xcf8] sm:$0xff] }
 0x1aa   : > { %4016 = vmatprep.subr.bf16.mxu0 %v5131_v46  ;;  %4059 = vmatprep.subr.bf16.mxu1 %v5133_v61  ;;  %v5205_v46 = vcombine.high %v3286_v40, %v3290_v41  ;;  %v3277_v61 = vld [vmem:[%s7317_s2 + $0xe00] sm:$0xff]  ;;  %v3231_v37 = vld [vmem:[%s7317_s2 + $0xc90] sm:$0xff]  ;;  %v3232_v40 = vld [vmem:[%s7317_s2 + $0xc98] sm:$0xff] }
 0x1ab   : > { %v5195_v51 = vcombine.high %v3277_v61, %v3281_v47  ;;  %v3235_v39 = vld [vmem:[%s7317_s2 + $0xcb0] sm:$0xff]  ;;  %v3236_v41 = vld [vmem:[%s7317_s2 + $0xcb8] sm:$0xff] }
 0x1ad   : > { %4017 = vmatpush1.bf16.msra.mxu0 %v5130_v63  ;;  %4060 = vmatpush1.bf16.msra.mxu1 %v5132_v2  ;;  %v3342_v63 = vrot.slane %v585_v13, 1  ;;  %v3343_v2 = vrot.slane %v587_v5, 2  ;;  %v3275_v13 = vld [vmem:[%s7317_s2 + $0xdf0] sm:$0xff]  ;;  %v5194_v5 = vcombine.low %v3277_v61, %v3281_v47  ;;  %v3224_v47 = vld [vmem:[%s7317_s2 + $0xc58] sm:$0xff] }
 0x1ae   : > { %4018 = vmatprep.subr.bf16.mxu0 %v5251_v48  ;;  %4061 = vmatprep.subr.bf16.mxu1 %v5253_v49  ;;  %v3347_v48 = vrot.slane %v3345_v43, 1  ;;  %v3348_v49 = vrot.slane %v592_v15, 2  ;;  %v3227_v61 = vld [vmem:[%s7317_s2 + $0xc70] sm:$0xff] }
 0x1af   : > { %v3344_v15 = vor.u32 %v3343_v2, %v3342_v63 }
 0x1b1   : > { %4019 = vmatpush2.bf16.msra.mxu0 %v5250_v55  ;;  %4062 = vmatpush2.bf16.msra.mxu1 %v5252_v58  ;;  %v3349_v55 = vor.u32 %v3348_v49, %v3347_v48  ;;  %v5196_v58 = vcombine.low %v3278_v60, %v3282_v62  ;;  %v5150_v60 = vcombine.low %v3231_v37, %v3235_v39  ;;  %v3215_v48 = vld [vmem:[%s7317_s2 + $0xc10] sm:$0xff] }
 0x1b2   : > { %4020 = vmatprep.subr.bf16.mxu0 %v5243_v38  ;;  %4063 = vmatprep.subr.bf16.mxu1 %v5245_v17  ;;  %v5191_v38 = vcombine.high %v3271_v54, %v3275_v13  ;;  %v5193_v17 = vcombine.high %v3272_v53, %v3276_v4  ;;  %v5152_v62 = vcombine.low %v3232_v40, %v3236_v41  ;;  %v3219_v49 = vld [vmem:[%s7317_s2 + $0xc30] sm:$0xff] }
 0x1b5   : > { %4021 = vmatpush2.bf16.msra.mxu0 %v5242_v21  ;;  %4064 = vmatpush2.bf16.msra.mxu1 %v5244_v7  ;;  %v6977_v21 = vsel %vm3341_vm2, %v3344_v15, %v3349_v55  ;;  %v5190_v7 = vcombine.low %v3271_v54, %v3275_v13  ;;  %v5135_v13 = vcombine.high %v3215_v48, %v3219_v49  ;;  %v3336_v15 = vld [vmem:[%s7317_s2 + $0xfd8] sm:$0xff] }
 0x1b6   : > { %4022 = vmatprep.subr.bf16.mxu0 %v5235_v8  ;;  %4065 = vmatprep.subr.bf16.mxu1 %v5237_v9  ;;  %v5192_v8 = vcombine.low %v3272_v53, %v3276_v4  ;;  %v5183_v9 = vcombine.high %v3263_v0, %v3267_v1  ;;  %v3335_v4 = vld [vmem:[%s7317_s2 + $0xfd0] sm:$0xff]  ;;  %v3340_v55 = vld [vmem:[%s7317_s2 + $0xff8] sm:$0xff] }
 0x1b9   : > { %4023 = vmatpush2.bf16.msra.mxu0 %v5234_v14  ;;  %4066 = vmatpush2.bf16.msra.mxu1 %v5236_v34  ;;  %v3260_v14 = vld [vmem:[%s7317_s2 + $0xd78] sm:$0xff]  ;;  %v5182_v34 = vcombine.low %v3263_v0, %v3267_v1  ;;  %v5257_v0 = vcombine.high %v3336_v15, %v3340_v55  ;;  %v3327_v1 = vld [vmem:[%s7317_s2 + $0xf90] sm:$0xff] }
 0x1ba   : > { %4024 = vmatprep.subr.bf16.mxu0 %v5227_v16  ;;  %4067 = vmatprep.subr.bf16.mxu1 %v5229_v18  ;;  %v5184_v16 = vcombine.low %v3264_v3, %v3268_v6  ;;  %v5175_v18 = vcombine.high %v3255_v56, %v3259_v11  ;;  %v5177_v19 = vcombine.high %v3256_v12, %v3260_v14  ;;  %v3331_v3 = vld [vmem:[%s7317_s2 + $0xfb0] sm:$0xff]  ;;  %v3328_v6 = vld [vmem:[%s7317_s2 + $0xf98] sm:$0xff] }
 0x1bd   : > { %4025 = vmatpush2.bf16.msra.mxu0 %v5226_v23  ;;  %4068 = vmatpush2.bf16.msra.mxu1 %v5228_v24  ;;  %v3252_v23 = vld [vmem:[%s7317_s2 + $0xd38] sm:$0xff]  ;;  %v5174_v24 = vcombine.low %v3255_v56, %v3259_v11  ;;  %v3319_v11 = vld [vmem:[%s7317_s2 + $0xf50] sm:$0xff] }
 0x1be   : > { %4026 = vmatprep.subr.bf16.mxu0 %v5219_v25  ;;  %4069 = vmatprep.subr.bf16.mxu1 %v5221_v26  ;;  %v5176_v25 = vcombine.low %v3256_v12, %v3260_v14  ;;  %v5167_v26 = vcombine.high %v3247_v28, %v3251_v20  ;;  %v5169_v27 = vcombine.high %v3248_v22, %v3252_v23  ;;  %v3323_v12 = vld [vmem:[%s7317_s2 + $0xf70] sm:$0xff]  ;;  %v3320_v14 = vld [vmem:[%s7317_s2 + $0xf58] sm:$0xff] }
 0x1c1   : > { %4027 = vmatpush2.bf16.msra.mxu0 %v5218_v32  ;;  %4070 = vmatpush2.bf16.msra.mxu1 %v5220_v33  ;;  %v5166_v32 = vcombine.low %v3247_v28, %v3251_v20  ;;  %v5168_v33 = vcombine.low %v3248_v22, %v3252_v23  ;;  %v3311_v20 = vld [vmem:[%s7317_s2 + $0xf10] sm:$0xff]  ;;  %v3312_v23 = vld [vmem:[%s7317_s2 + $0xf18] sm:$0xff] }
 0x1c2   : > { %4028 = vmatprep.subr.bf16.mxu0 %v5211_v35  ;;  %4071 = vmatprep.subr.bf16.mxu1 %v5213_v36  ;;  %v5159_v35 = vcombine.high %v3239_v29, %v3243_v30  ;;  %v3315_v22 = vld [vmem:[%s7317_s2 + $0xf30] sm:$0xff] }
 0x1c5   : > { %4029 = vmatpush2.bf16.msra.mxu0 %v5210_v42  ;;  %4072 = vmatpush2.bf16.msra.mxu1 %v5212_v44  ;;  %v5158_v42 = vcombine.low %v3239_v29, %v3243_v30  ;;  %v5151_v44 = vcombine.high %v3231_v37, %v3235_v39  ;;  %v3303_v30 = vld [vmem:[%s7317_s2 + $0xed0] sm:$0xff] }
 0x1c6   : > { %4030 = vmatprep.subr.bf16.mxu0 %v5203_v45  ;;  %4073 = vmatprep.subr.bf16.mxu1 %v5205_v46  ;;  %v5153_v45 = vcombine.high %v3232_v40, %v3236_v41  ;;  %v3223_v46 = vld [vmem:[%s7317_s2 + $0xc50] sm:$0xff]  ;;  %v3296_v41 = vld [vmem:[%s7317_s2 + $0xe98] sm:$0xff] }
 0x1c7   : > { %v5143_v63 = vcombine.high %v3223_v46, %v3227_v61  ;;  %v3295_v39 = vld [vmem:[%s7317_s2 + $0xe90] sm:$0xff] }
 0x1c8   : > { %v3299_v40 = vld [vmem:[%s7317_s2 + $0xeb0] sm:$0xff] }
 0x1c9   : > { %4031 = vmatpush2.bf16.msra.mxu0 %v5202_v57  ;;  %4074 = vmatpush2.bf16.msra.mxu1 %v5204_v50  ;;  %v3228_v57 = vld [vmem:[%s7317_s2 + $0xc78] sm:$0xff] }
 0x1ca   : > { %4032 = vmatprep.subr.bf16.mxu0 %v5195_v51  ;;  %4075 = vmatprep.subr.bf16.mxu1 %v5197_v52  ;;  %v5145_v2 = vcombine.high %v3224_v47, %v3228_v57  ;;  %v3216_v50 = vld [vmem:[%s7317_s2 + $0xc18] sm:$0xff]  ;;  %v5142_v52 = vcombine.low %v3223_v46, %v3227_v61  ;;  %v5144_v54 = vcombine.low %v3224_v47, %v3228_v57  ;;  %v3287_v61 = vld [vmem:[%s7317_s2 + $0xe50] sm:$0xff] }
 0x1cb   : > { %v3220_v51 = vld [vmem:[%s7317_s2 + $0xc38] sm:$0xff]  ;;  %v3291_v47 = vld [vmem:[%s7317_s2 + $0xe70] sm:$0xff] }
 0x1cc   : > { %v5137_v53 = vcombine.high %v3216_v50, %v3220_v51  ;;  %v3288_v57 = vld [vmem:[%s7317_s2 + $0xe58] sm:$0xff] }
 0x1cd   : > { %4033 = vmatpush2.bf16.msra.mxu0 %v5194_v5  ;;  %4076 = vmatpush2.bf16.msra.mxu1 %v5196_v58  ;;  %v3339_v5 = vld [vmem:[%s7317_s2 + $0xff0] sm:$0xff]  ;;  %v5134_v58 = vcombine.low %v3215_v48, %v3219_v49 }
 0x1ce   : > { %4088 = vmatprep.subr.bf16.mxu0 %v5191_v38  ;;  %4131 = vmatprep.subr.bf16.mxu1 %v5193_v17  ;;  %v5136_v38 = vcombine.low %v3216_v50, %v3220_v51  ;;  %v5255_v17 = vcombine.high %v3335_v4, %v3339_v5  ;;  %v3279_v49 = vld [vmem:[%s7317_s2 + $0xe10] sm:$0xff]  ;;  %v3280_v51 = vld [vmem:[%s7317_s2 + $0xe18] sm:$0xff] }
 0x1cf   : > { %v3283_v50 = vld [vmem:[%s7317_s2 + $0xe30] sm:$0xff] }
 0x1d0   : > { %4035 = vmatmul.mubr.bf16.vlgmr.msra.gmra.mxu0 %v6977_v21  ;;  %4078 = vmatmul.mubr.bf16.vlgmr.msra.gmra.mxu1 %v6977_v21 }
 0x1d1   : > { %4089 = vmatpush1.bf16.msra.mxu0 %v5190_v7  ;;  %4132 = vmatpush1.bf16.msra.mxu1 %v5192_v8  ;;  %v3332_v7 = vld [vmem:[%s7317_s2 + $0xfb8] sm:$0xff]  ;;  %v5254_v8 = vcombine.low %v3335_v4, %v3339_v5  ;;  %v5198_v5 = vcombine.low %v3279_v49, %v3283_v50 }
 0x1d2   : > { %4090 = vmatprep.subr.bf16.mxu0 %v5183_v9  ;;  %4133 = vmatprep.subr.bf16.mxu1 %v5185_v10  ;;  %v5256_v9 = vcombine.low %v3336_v15, %v3340_v55  ;;  %v5247_v10 = vcombine.high %v3327_v1, %v3331_v3  ;;  %v5249_v56 = vcombine.high %v3328_v6, %v3332_v7  ;;  %v5371_v55 = vld [vmem:[%s7318_s3 + $0x78] sm:$0xff]  }
 0x1d3   : > { %4120 = vmatprep.mubr.bf16.mxu0 %v6784_v59  ;;  %4163 = vmatprep.mubr.bf16.mxu1 %v6784_v59  ;;  %v3240_v59 = vld [vmem:[%s7317_s2 + $0xcd8] sm:$0xff] }
 0x1d4   : > { %v5161_v36 = vcombine.high %v3240_v59, %v3244_v31  ;;  %v5160_v43 = vcombine.low %v3240_v59, %v3244_v31  ;;  %v3307_v59 = vld [vmem:[%s7317_s2 + $0xef0] sm:$0xff]  ;;  %v3304_v31 = vld [vmem:[%s7317_s2 + $0xed8] sm:$0xff] }
 0x1d5   : > { %4091 = vmatpush1.bf16.msra.mxu0 %v5182_v34  ;;  %4134 = vmatpush1.bf16.msra.mxu1 %v5184_v16  ;;  %v3324_v34 = vld [vmem:[%s7317_s2 + $0xf78] sm:$0xff]  ;;  %v5246_v16 = vcombine.low %v3327_v1, %v3331_v3  ;;  %v5377_v1 = vld [vmem:[%s7318_s3 + $0x30] sm:$0xff]  }
 0x1d6   : > { %4092 = vmatprep.subr.bf16.mxu0 %v5175_v18  ;;  %4135 = vmatprep.subr.bf16.mxu1 %v5177_v19  ;;  %v5248_v18 = vcombine.low %v3328_v6, %v3332_v7  ;;  %v5239_v19 = vcombine.high %v3319_v11, %v3323_v12  ;;  %v5241_v28 = vcombine.high %v3320_v14, %v3324_v34  ;;  %v5378_v3 = vld [vmem:[%s7318_s3 + $0xb0] sm:$0xff]   ;;  %v5379_v6 = vld [vmem:[%s7318_s3 + $0x68] sm:$0xff]  }
 0x1d7   : > { %v5380_v7 = vld [vmem:[%s7318_s3 + $0xe8] sm:$0xff]  }
 0x1d9   : > { %4093 = vmatpush1.bf16.msra.mxu0 %v5174_v24  ;;  %4136 = vmatpush1.bf16.msra.mxu1 %v5176_v25  ;;  %v3316_v24 = vld [vmem:[%s7317_s2 + $0xf38] sm:$0xff]  ;;  %v5238_v25 = vcombine.low %v3319_v11, %v3323_v12  ;;  %v5385_v11 = vld [vmem:[%s7318_s3 + $0x20] sm:$0xff]  }
 0x1da   : > { %4094 = vmatprep.subr.bf16.mxu0 %v5167_v26  ;;  %4137 = vmatprep.subr.bf16.mxu1 %v5169_v27  ;;  %v5240_v26 = vcombine.low %v3320_v14, %v3324_v34  ;;  %v5231_v27 = vcombine.high %v3311_v20, %v3315_v22  ;;  %v5233_v29 = vcombine.high %v3312_v23, %v3316_v24  ;;  %v5386_v12 = vld [vmem:[%s7318_s3 + $0xa0] sm:$0xff]   ;;  %v5387_v14 = vld [vmem:[%s7318_s3 + $0x58] sm:$0xff]  }
 0x1db   : > { %v5388_v34 = vld [vmem:[%s7318_s3 + $0xd8] sm:$0xff]  }
 0x1dd   : > { %4095 = vmatpush1.bf16.msra.mxu0 %v5166_v32  ;;  %4138 = vmatpush1.bf16.msra.mxu1 %v5168_v33  ;;  %v3308_v32 = vld [vmem:[%s7317_s2 + $0xef8] sm:$0xff]  ;;  %v5230_v33 = vcombine.low %v3311_v20, %v3315_v22  ;;  %v5393_v20 = vld [vmem:[%s7318_s3 + $0x10] sm:$0xff]  }
 0x1de   : > { %4096 = vmatprep.subr.bf16.mxu0 %v5159_v35  ;;  %4139 = vmatprep.subr.bf16.mxu1 %v5161_v36  ;;  %v5232_v35 = vcombine.low %v3312_v23, %v3316_v24  ;;  %v5223_v36 = vcombine.high %v3303_v30, %v3307_v59  ;;  %v5225_v37 = vcombine.high %v3304_v31, %v3308_v32  ;;  %v5394_v22 = vld [vmem:[%s7318_s3 + $0x90] sm:$0xff]   ;;  %v5395_v23 = vld [vmem:[%s7318_s3 + $0x48] sm:$0xff]  }
 0x1df   : > { %v5396_v24 = vld [vmem:[%s7318_s3 + $0xc8] sm:$0xff]  }
 0x1e1   : > { %4097 = vmatpush1.bf16.msra.mxu0 %v5158_v42  ;;  %4140 = vmatpush1.bf16.msra.mxu1 %v5160_v43  ;;  %v3300_v42 = vld [vmem:[%s7317_s2 + $0xeb8] sm:$0xff]  ;;  %v5222_v43 = vcombine.low %v3303_v30, %v3307_v59  ;;  %v5401_v30 = vld [vmem:[%s7318_s3] sm:$0xff]  }
 0x1e2   : > { %4098 = vmatprep.subr.bf16.mxu0 %v5151_v44  ;;  %4141 = vmatprep.subr.bf16.mxu1 %v5153_v45  ;;  %v5224_v44 = vcombine.low %v3304_v31, %v3308_v32  ;;  %v5215_v45 = vcombine.high %v3295_v39, %v3299_v40  ;;  %v5217_v46 = vcombine.high %v3296_v41, %v3300_v42  ;;  %v5402_v59 = vld [vmem:[%s7318_s3 + $0x80] sm:$0xff]   ;;  %v1284_v31 = vpop.f32.mrf.mxu0  ;;  %v1327_v32 = vpop.f32.mrf.mxu1 }
 0x1e5   : > { %4099 = vmatpush1.bf16.msra.mxu0 %v5150_v60  ;;  %4142 = vmatpush1.bf16.msra.mxu1 %v5152_v62  ;;  %v3292_v60 = vld [vmem:[%s7317_s2 + $0xe78] sm:$0xff]  ;;  %v5214_v62 = vcombine.low %v3295_v39, %v3299_v40 }
 0x1e6   : > { %4100 = vmatprep.subr.bf16.mxu0 %v5143_v63  ;;  %4143 = vmatprep.subr.bf16.mxu1 %v5145_v2  ;;  %v5216_v63 = vcombine.low %v3296_v41, %v3300_v42  ;;  %v5207_v2 = vcombine.high %v3287_v61, %v3291_v47  ;;  %v5209_v48 = vcombine.high %v3288_v57, %v3292_v60 }
 0x1e9   : > { %4101 = vmatpush1.bf16.msra.mxu0 %v5142_v52  ;;  %4144 = vmatpush1.bf16.msra.mxu1 %v5144_v54  ;;  %v3284_v52 = vld [vmem:[%s7317_s2 + $0xe38] sm:$0xff]  ;;  %v5206_v54 = vcombine.low %v3287_v61, %v3291_v47 }
 0x1ea   : > { %4102 = vmatprep.subr.bf16.mxu0 %v5135_v13  ;;  %4145 = vmatprep.subr.bf16.mxu1 %v5137_v53  ;;  %v5208_v13 = vcombine.low %v3288_v57, %v3292_v60  ;;  %v5199_v53 = vcombine.high %v3279_v49, %v3283_v50  ;;  %v5201_v4 = vcombine.high %v3280_v51, %v3284_v52 }
 0x1eb   : > { %v5200_v15 = vcombine.low %v3280_v51, %v3284_v52 }
 0x1ed   : > { %4103 = vmatpush1.bf16.msra.mxu0 %v5134_v58  ;;  %4146 = vmatpush1.bf16.msra.mxu1 %v5136_v38  ;;  %v5372_v58 = vld [vmem:[%s7318_s3 + $0xf8] sm:$0xff]  }
 0x1ee   : > { %4104 = vmatprep.subr.bf16.mxu0 %v5255_v17  ;;  %4147 = vmatprep.subr.bf16.mxu1 %v5257_v0  ;;  %v5373_v38 = vld [vmem:[%s7318_s3 + $0x38] sm:$0xff]   ;;  %v5376_v0 = vld [vmem:[%s7318_s3 + $0xf0] sm:$0xff]  }
 0x1ef   : > { %v5374_v17 = vld [vmem:[%s7318_s3 + $0xb8] sm:$0xff]  }
 0x1f1   : > { %4105 = vmatpush2.bf16.msra.mxu0 %v5254_v8  ;;  %4148 = vmatpush2.bf16.msra.mxu1 %v5256_v9  ;;  %v5381_v8 = vld [vmem:[%s7318_s3 + $0x28] sm:$0xff]  }
 0x1f2   : > { %4106 = vmatprep.subr.bf16.mxu0 %v5247_v10  ;;  %4149 = vmatprep.subr.bf16.mxu1 %v5249_v56  ;;  %v5382_v9 = vld [vmem:[%s7318_s3 + $0xa8] sm:$0xff]   ;;  %v5383_v10 = vld [vmem:[%s7318_s3 + $0x60] sm:$0xff]  }
 0x1f3   : > { %v5384_v56 = vld [vmem:[%s7318_s3 + $0xe0] sm:$0xff]  }
 0x1f5   : > { %4107 = vmatpush2.bf16.msra.mxu0 %v5246_v16  ;;  %4150 = vmatpush2.bf16.msra.mxu1 %v5248_v18  ;;  %v5389_v16 = vld [vmem:[%s7318_s3 + $0x18] sm:$0xff]  }
 0x1f6   : > { %4108 = vmatprep.subr.bf16.mxu0 %v5239_v19  ;;  %4151 = vmatprep.subr.bf16.mxu1 %v5241_v28  ;;  %v5390_v18 = vld [vmem:[%s7318_s3 + $0x98] sm:$0xff]   ;;  %v5391_v19 = vld [vmem:[%s7318_s3 + $0x50] sm:$0xff]  }
 0x1f7   : > { %v5392_v28 = vld [vmem:[%s7318_s3 + $0xd0] sm:$0xff]  }
 0x1f9   : > { %4109 = vmatpush2.bf16.msra.mxu0 %v5238_v25  ;;  %4152 = vmatpush2.bf16.msra.mxu1 %v5240_v26  ;;  %v5397_v25 = vld [vmem:[%s7318_s3 + $0x8] sm:$0xff]  }
 0x1fa   : > { %4110 = vmatprep.subr.bf16.mxu0 %v5231_v27  ;;  %4153 = vmatprep.subr.bf16.mxu1 %v5233_v29  ;;  %v5398_v26 = vld [vmem:[%s7318_s3 + $0x88] sm:$0xff]   ;;  %v5399_v27 = vld [vmem:[%s7318_s3 + $0x40] sm:$0xff]  }
 0x1fb   : > { %v5400_v29 = vld [vmem:[%s7318_s3 + $0xc0] sm:$0xff]  }
 0x1fd   : > { %4111 = vmatpush2.bf16.msra.mxu0 %v5230_v33  ;;  %4154 = vmatpush2.bf16.msra.mxu1 %v5232_v35  ;;  %v1286_v33 = vpop.f32.mrf.mxu0  ;;  %v1329_v35 = vpop.f32.mrf.mxu1 }
 0x1fe   : > { %4112 = vmatprep.subr.bf16.mxu0 %v5223_v36  ;;  %4155 = vmatprep.subr.bf16.mxu1 %v5225_v37 }
 0x1ff   : > { %v1288_v36 = vpop.f32.mrf.mxu0  ;;  %v1331_v37 = vpop.f32.mrf.mxu1 }
 0x201   : > { %4113 = vmatpush2.bf16.msra.mxu0 %v5222_v43  ;;  %4156 = vmatpush2.bf16.msra.mxu1 %v5224_v44  ;;  %v1290_v39 = vpop.f32.mrf.mxu0  ;;  %v1333_v40 = vpop.f32.mrf.mxu1 }
 0x202   : > { %4114 = vmatprep.subr.bf16.mxu0 %v5215_v45  ;;  %4157 = vmatprep.subr.bf16.mxu1 %v5217_v46 }
 0x203   : > { %v1370_v41 = vpop.f32.mrf.mxu0  ;;  %v1413_v42 = vpop.f32.mrf.mxu1 }
 0x205   : > { %4115 = vmatpush2.bf16.msra.mxu0 %v5214_v62  ;;  %4158 = vmatpush2.bf16.msra.mxu1 %v5216_v63  ;;  %v1372_v43 = vpop.f32.mrf.mxu0  ;;  %v1415_v44 = vpop.f32.mrf.mxu1 }
 0x206   : > { %4116 = vmatprep.subr.bf16.mxu0 %v5207_v2  ;;  %4159 = vmatprep.subr.bf16.mxu1 %v5209_v48 }
 0x207   : > { %v1374_v45 = vpop.f32.mrf.mxu0  ;;  %v1417_v46 = vpop.f32.mrf.mxu1 }
 0x209   : > { %4117 = vmatpush2.bf16.msra.mxu0 %v5206_v54  ;;  %4160 = vmatpush2.bf16.msra.mxu1 %v5208_v13  ;;  %v1376_v61 = vpop.f32.mrf.mxu0  ;;  %v1419_v47 = vpop.f32.mrf.mxu1 }
 0x20a   : > { %4118 = vmatprep.subr.bf16.mxu0 %v5199_v53  ;;  %4161 = vmatprep.subr.bf16.mxu1 %v5201_v4 }
 0x20b   : > { %v2106_v57 = vpop.f32.mrf.mxu0  ;;  %v2149_v60 = vpop.f32.mrf.mxu1 }
 0x20d   : > { %4119 = vmatpush2.bf16.msra.mxu0 %v5198_v5  ;;  %4162 = vmatpush2.bf16.msra.mxu1 %v5200_v15  ;;  %v2108_v62 = vpop.f32.mrf.mxu0  ;;  %v2151_v63 = vpop.f32.mrf.mxu1 }
 0x20e   : > { %5295 = vmatprep.subr.bf16.mxu0 %v5371_v55  ;;  %5317 = vmatprep.subr.bf16.mxu1 %v5372_v58 }
 0x20f   : > { %v2110_v2 = vpop.f32.mrf.mxu0  ;;  %v2153_v48 = vpop.f32.mrf.mxu1 }
 0x210   : > { %4121 = vmatmul.mubr.bf16.vlgmr.msra.gmra.mxu0 %v6977_v21  ;;  %4164 = vmatmul.mubr.bf16.vlgmr.msra.gmra.mxu1 %v6977_v21  ;;  %v5375_v21 = vld [vmem:[%s7318_s3 + $0x70] sm:$0xff]  }
 0x211   : > { %5296 = vmatpush3.bf16.msra.mxu0 %v5373_v38  ;;  %5318 = vmatpush3.bf16.msra.mxu1 %v5374_v17  ;;  %v2112_v49 = vpop.f32.mrf.mxu0  ;;  %v2155_v50 = vpop.f32.mrf.mxu1 }
 0x212   : > { %5297 = vmatprep.subr.bf16.mxu0 %v5375_v21  ;;  %5319 = vmatprep.subr.bf16.mxu1 %v5376_v0 }
 0x213   : > { %v2192_v51 = vpop.f32.mrf.mxu0  ;;  %v2235_v52 = vpop.f32.mrf.mxu1 }
 0x215   : > { %5298 = vmatpush3.bf16.msra.mxu0 %v5377_v1  ;;  %5320 = vmatpush3.bf16.msra.mxu1 %v5378_v3  ;;  %v2194_v54 = vpop.f32.mrf.mxu0  ;;  %v2237_v13 = vpop.f32.mrf.mxu1 }
 0x216   : > { %5299 = vmatprep.subr.bf16.mxu0 %v5379_v6  ;;  %5321 = vmatprep.subr.bf16.mxu1 %v5380_v7 }
 0x217   : > { %v2196_v53 = vpop.f32.mrf.mxu0  ;;  %v2239_v4 = vpop.f32.mrf.mxu1 }
 0x219   : > { %5300 = vmatpush3.bf16.msra.mxu0 %v5381_v8  ;;  %5322 = vmatpush3.bf16.msra.mxu1 %v5382_v9  ;;  %v2198_v5 = vpop.f32.mrf.mxu0  ;;  %v2241_v15 = vpop.f32.mrf.mxu1 }
 0x21a   : > { %5301 = vmatprep.subr.bf16.mxu0 %v5383_v10  ;;  %5323 = vmatprep.subr.bf16.mxu1 %v5384_v56 }
 0x21b   : > { %v3059_v55 = vpop.f32.mrf.mxu0  ;;  %v3102_v58 = vpop.f32.mrf.mxu1 }
 0x21d   : > { %5302 = vmatpush3.bf16.msra.mxu0 %v5385_v11  ;;  %5324 = vmatpush3.bf16.msra.mxu1 %v5386_v12  ;;  %v3061_v38 = vpop.f32.mrf.mxu0  ;;  %v3104_v17 = vpop.f32.mrf.mxu1 }
 0x21e   : > { %5303 = vmatprep.subr.bf16.mxu0 %v5387_v14  ;;  %5325 = vmatprep.subr.bf16.mxu1 %v5388_v34 }
 0x21f   : > { %v3063_v21 = vpop.f32.mrf.mxu0  ;;  %v3106_v0 = vpop.f32.mrf.mxu1 }
 0x221   : > { %5304 = vmatpush3.bf16.msra.mxu0 %v5389_v16  ;;  %5326 = vmatpush3.bf16.msra.mxu1 %v5390_v18  ;;  %v3065_v1 = vpop.f32.mrf.mxu0  ;;  %v3108_v3 = vpop.f32.mrf.mxu1 }
 0x222   : > { %5305 = vmatprep.subr.bf16.mxu0 %v5391_v19  ;;  %5327 = vmatprep.subr.bf16.mxu1 %v5392_v28  ;;  %v2107_v19 = vadd.f32 %v2106_v57, %v1284_v31  ;;  %v2150_v28 = vadd.f32 %v2149_v60, %v1327_v32  ;;  %v2238_v31 = vadd.f32 %v2237_v13, %v1415_v44 }
 0x223   : > { %v2197_v57 = vadd.f32 %v2196_v53, %v1374_v45  ;;  %v2240_v32 = vadd.f32 %v2239_v4, %v1417_v46 }
 0x225   : > { %5306 = vmatpush3.bf16.msra.mxu0 %v5393_v20  ;;  %5328 = vmatpush3.bf16.msra.mxu1 %v5394_v22  ;;  %v2109_v20 = vadd.f32 %v2108_v62, %v1286_v33  ;;  %v2152_v22 = vadd.f32 %v2151_v63, %v1329_v35  ;;  %v2199_v33 = vadd.f32 %v2198_v5, %v1376_v61 }
 0x226   : > { %5307 = vmatprep.subr.bf16.mxu0 %v5395_v23  ;;  %5329 = vmatprep.subr.bf16.mxu1 %v5396_v24  ;;  %v2111_v23 = vadd.f32 %v2110_v2, %v1288_v36  ;;  %v2154_v24 = vadd.f32 %v2153_v48, %v1331_v37  ;;  %v2242_v62 = vadd.f32 %v2241_v15, %v1419_v47 }
 0x227   : > { %v3197_v35 = vadd.f32 %v3059_v55, %v2107_v19  ;;  %v3199_v63 = vadd.f32 %v3102_v58, %v2150_v28  ;;  %v3198_v2 = vadd.f32 %v3061_v38, %v2109_v20  ;;  %v3200_v36 = vadd.f32 %v3104_v17, %v2152_v22 }
 0x228   : > { %v3205_v37 = vadd.f32 %v3063_v21, %v2111_v23  ;;  %v3207_v48 = vadd.f32 %v3106_v0, %v2154_v24 }
 0x229   : > { %5308 = vmatpush3.bf16.msra.mxu0 %v5397_v25  ;;  %5330 = vmatpush3.bf16.msra.mxu1 %v5398_v26  ;;  %v2113_v25 = vadd.f32 %v2112_v49, %v1290_v39  ;;  %v2156_v26 = vadd.f32 %v2155_v50, %v1333_v40 }
 0x22a   : > { %5309 = vmatprep.subr.bf16.mxu0 %v5399_v27  ;;  %5331 = vmatprep.subr.bf16.mxu1 %v5400_v29  ;;  %v2193_v27 = vadd.f32 %v2192_v51, %v1370_v41  ;;  %v2236_v29 = vadd.f32 %v2235_v52, %v1413_v42 }
 0x22b   : > { %v3206_v39 = vadd.f32 %v3065_v1, %v2113_v25  ;;  %v3208_v49 = vadd.f32 %v3108_v3, %v2156_v26 }
 0x22d   : > { %5310 = vmatpush3.bf16.msra.mxu0 %v5401_v30  ;;  %5332 = vmatpush3.bf16.msra.mxu1 %v5402_v59  ;;  %v2195_v59 = vadd.f32 %v2194_v54, %v1372_v43 }
 0x250   : > { %v3145_v6 = vpop.f32.mrf.mxu0  ;;  %v3188_v7 = vpop.f32.mrf.mxu1 }
 0x251   : > { %v3201_v42 = vadd.f32 %v3145_v6, %v2193_v27  ;;  %v3203_v51 = vadd.f32 %v3188_v7, %v2236_v29 }
 0x252   : > { %v3147_v8 = vpop.f32.mrf.mxu0  ;;  %v3190_v9 = vpop.f32.mrf.mxu1 }
 0x253   : > { %v3202_v46 = vadd.f32 %v3147_v8, %v2195_v59  ;;  %v3204_v52 = vadd.f32 %v3190_v9, %v2238_v31 }
 0x254   : > { %v3149_v10 = vpop.f32.mrf.mxu0  ;;  %v3192_v56 = vpop.f32.mrf.mxu1 }
 0x255   : > { %v3209_v61 = vadd.f32 %v3149_v10, %v2197_v57  ;;  %v3211_v13 = vadd.f32 %v3192_v56, %v2240_v32 }
 0x256   : > { %v3151_v11 = vpop.f32.mrf.mxu0  ;;  %v3194_v12 = vpop.f32.mrf.mxu1 }
 0x257   : > { %v3210_v53 = vadd.f32 %v3151_v11, %v2199_v33  ;;  %v3212_v55 = vadd.f32 %v3194_v12, %v2242_v62 }
 0x290   : > { %v4036_v14 = vpop.f32.mrf.mxu0  ;;  %v4079_v34 = vpop.f32.mrf.mxu1 }
 0x291   : > { %v4174_v40 = vadd.f32 %v4036_v14, %v3197_v35  ;;  %v4176_v50 = vadd.f32 %v4079_v34, %v3199_v63 }
 0x292   : > { %v4038_v16 = vpop.f32.mrf.mxu0  ;;  %v4081_v18 = vpop.f32.mrf.mxu1 }
 0x293   : > { %v4175_v43 = vadd.f32 %v4038_v16, %v3198_v2  ;;  %v4177_v44 = vadd.f32 %v4081_v18, %v3200_v36  ;;  %v4190_v58 = vmul.f32 %v4174_v40, %v4174_v40  ;;  %v4192_v38 = vmul.f32 %v4176_v50, %v4176_v50 }
 0x294   : > { %v4040_v30 = vpop.f32.mrf.mxu0  ;;  %v4083_v60 = vpop.f32.mrf.mxu1 }
 0x295   : > { %v4182_v47 = vadd.f32 %v4040_v30, %v3205_v37  ;;  %v4184_v4 = vadd.f32 %v4083_v60, %v3207_v48  ;;  %v4191_v0 = vmul.f32 %v4175_v43, %v4175_v43  ;;  %v4193_v1 = vmul.f32 %v4177_v44, %v4177_v44 }
 0x296   : > { %v4042_v41 = vpop.f32.mrf.mxu0  ;;  %v4085_v45 = vpop.f32.mrf.mxu1 }
 0x297   : > { %v4194_v8 = vmul.f32 %v4182_v47, %v4182_v47  ;;  %v4183_v9 = vadd.f32 %v4042_v41, %v3206_v39  ;;  %v4196_v56 = vmul.f32 %v4184_v4, %v4184_v4  ;;  %v4185_v19 = vadd.f32 %v4085_v45, %v3208_v49 }
 0x299   : > { %v4195_v31 = vmul.f32 %v4183_v9, %v4183_v9  ;;  %v4197_v60 = vmul.f32 %v4185_v19, %v4185_v19 }
 0x2d0   : > { %v4122_v54 = vpop.f32.mrf.mxu0  ;;  %v4165_v15 = vpop.f32.mrf.mxu1 }
 0x2d1   : > { %v4178_v5 = vadd.f32 %v4122_v54, %v3201_v42  ;;  %v4180_v17 = vadd.f32 %v4165_v15, %v3203_v51 }
 0x2d2   : > { %v4124_v21 = vpop.f32.mrf.mxu0  ;;  %v4167_v7 = vpop.f32.mrf.mxu1 }
 0x2d3   : > { %v4198_v3 = vmul.f32 %v4178_v5, %v4178_v5  ;;  %v4179_v6 = vadd.f32 %v4124_v21, %v3202_v46  ;;  %v4200_v10 = vmul.f32 %v4180_v17, %v4180_v17  ;;  %v4181_v14 = vadd.f32 %v4167_v7, %v3204_v52 }
 0x2d4   : > { %v4126_v34 = vpop.f32.mrf.mxu0  ;;  %v4169_v12 = vpop.f32.mrf.mxu1 }
 0x2d5   : > { %v7249_v11 = vadd.f32 %v4198_v3, %v4190_v58  ;;  %v4199_v16 = vmul.f32 %v4179_v6, %v4179_v6  ;;  %v4186_v18 = vadd.f32 %v4126_v34, %v3209_v61  ;;  %v7251_v28 = vadd.f32 %v4200_v10, %v4192_v38 }
 0x2d6   : > { %v4201_v20 = vmul.f32 %v4181_v14, %v4181_v14  ;;  %v4188_v22 = vadd.f32 %v4169_v12, %v3211_v13  ;;  %v4128_v23 = vpop.f32.mrf.mxu0  ;;  %v4171_v27 = vpop.f32.mrf.mxu1 }
 0x2d7   : > { %5403 = vrsqrt.f32 %v7249_v11  ;;  %v7254_v24 = vadd.f32 %v4199_v16, %v4191_v0  ;;  %v4202_v25 = vmul.f32 %v4186_v18, %v4186_v18  ;;  %v4187_v26 = vadd.f32 %v4128_v23, %v3210_v53 }
 0x2d8   : > { %5405 = vrsqrt.f32 %v7251_v28  ;;  %v7257_v29 = vadd.f32 %v4201_v20, %v4193_v1  ;;  %v4204_v30 = vmul.f32 %v4188_v22, %v4188_v22  ;;  %v4189_v59 = vadd.f32 %v4171_v27, %v3212_v55 }
 0x2d9   : > { %5407 = vrsqrt.f32 %v7254_v24  ;;  %v4210_v57 = vadd.f32 %v4202_v25, %v4194_v8  ;;  %v4203_v32 = vmul.f32 %v4187_v26, %v4187_v26  ;;  %vm4223_vm3 = vcmp.eq.f32.partialorder %v7254_v24, inf }
 0x2da   : > { %5409 = vrsqrt.f32 %v7257_v29  ;;  %v4212_v33 = vadd.f32 %v4204_v30, %v4196_v56  ;;  %v4205_v62 = vmul.f32 %v4189_v59, %v4189_v59  ;;  %v4226_v36 = vand.u32 2147483648, %v7254_v24 }
 0x2db   : > { %5411 = vrsqrt.f32 %v4210_v57  ;;  %v4211_v35 = vadd.f32 %v4203_v32, %v4195_v31  ;;  %vm4225_vm4 = vcmp.eq.f32.partialorder %v7254_v24, 0.0  ;;  %vm4237_vm7 = vcmp.eq.f32.partialorder %v7257_v29, inf }
 0x2dc   : > { %5413 = vrsqrt.f32 %v4212_v33  ;;  %v4213_v63 = vadd.f32 %v4205_v62, %v4197_v60  ;;  %v4240_v48 = vand.u32 2147483648, %v7257_v29  ;;  %vm4239_vm8 = vcmp.eq.f32.partialorder %v7257_v29, 0.0 }
 0x2dd   : > { %5415 = vrsqrt.f32 %v4211_v35  ;;  %vm4251_vm5 = vcmp.eq.f32.partialorder %v4211_v35, inf  ;;  %vm4253_vm6 = vcmp.eq.f32.partialorder %v4211_v35, 0.0  ;;  %v4254_v49 = vand.u32 2147483648, %v4211_v35 }
 0x2de   : > { %5417 = vrsqrt.f32 %v4213_v63  ;;  %vm4265_vm9 = vcmp.eq.f32.partialorder %v4213_v63, inf  ;;  %vm4267_vm10 = vcmp.eq.f32.partialorder %v4213_v63, 0.0  ;;  %v4268_v40 = vand.u32 2147483648, %v4213_v63 }
 0x2df   : > { %vm4216_vm11 = vcmp.eq.f32.partialorder %v7249_v11, inf  ;;  %vm4218_vm12 = vcmp.eq.f32.partialorder %v7249_v11, 0.0  ;;  %v4219_v42 = vand.u32 2147483648, %v7249_v11  ;;  %vm4244_vm13 = vcmp.eq.f32.partialorder %v4210_v57, inf }
 0x2e0   : > { %vm4246_vm14 = vcmp.eq.f32.partialorder %v4210_v57, 0.0  ;;  %v4247_v52 = vand.u32 2147483648, %v4210_v57  ;;  %vm4230_vm15 = vcmp.eq.f32.partialorder %v7251_v28, inf  ;;  %vm4232_vm0 = vcmp.eq.f32.partialorder %v7251_v28, 0.0 }
 0x2e1   : > { %v4233_v54 = vand.u32 2147483648, %v7251_v28  ;;  %vm4258_vm1 = vcmp.eq.f32.partialorder %v4212_v33, inf  ;;  %v4261_v55 = vand.u32 2147483648, %v4212_v33  ;;  %vm4260_vm2 = vcmp.eq.f32.partialorder %v4212_v33, 0.0 }
 0x2e4   : > { %v5404_v2 = vpop.eup %5403 }
 0x2e5   : > { %v5406_v37 = vpop.eup %5405  ;;  %v4215_v44 = vmul.f32 %v5404_v2, %v7249_v11 }
 0x2e6   : > { %v5408_v39 = vpop.eup %5407  ;;  %v4229_v61 = vmul.f32 %v5406_v37, %v7251_v28 }
 0x2e7   : > { %v5410_v50 = vpop.eup %5409  ;;  %v4222_v41 = vmul.f32 %v5408_v39, %v7254_v24  ;;  %v4217_v17 = vsel %vm4216_vm11, %v7249_v11, %v4215_v44 }
 0x2e8   : > { %v5412_v51 = vpop.eup %5411  ;;  %v4236_v43 = vmul.f32 %v5410_v50, %v7257_v29  ;;  %v4231_v3 = vsel %vm4230_vm15, %v7251_v28, %v4229_v61  ;;  %v4220_v56 = vsel %vm4218_vm12, %v4219_v42, %v4217_v17 }
 0x2e9   : > { %v5414_v45 = vpop.eup %5413  ;;  %v4243_v46 = vmul.f32 %v5412_v51, %v4210_v57  ;;  %v4224_v4 = vsel %vm4223_vm3, %v7254_v24, %v4222_v41  ;;  %v4234_v12 = vsel %vm4232_vm0, %v4233_v54, %v4231_v3 }
 0x2ea   : > { %v5416_v47 = vpop.eup %5415  ;;  %v4257_v13 = vmul.f32 %v5414_v45, %v4212_v33  ;;  %v4238_v58 = vsel %vm4237_vm7, %v7257_v29, %v4236_v43  ;;  %v4227_v6 = vsel %vm4225_vm4, %v4226_v36, %v4224_v4 }
 0x2eb   : > { %v5418_v53 = vpop.eup %5417  ;;  %v4250_v5 = vmul.f32 %v5416_v47, %v4211_v35  ;;  %v4245_v15 = vsel %vm4244_vm13, %v4210_v57, %v4243_v46  ;;  %v4241_v14 = vsel %vm4239_vm8, %v4240_v48, %v4238_v58 }
 0x2ec   : > { %v4264_v38 = vmul.f32 %v5418_v53, %v4213_v63  ;;  %v4259_v21 = vsel %vm4258_vm1, %v4212_v33, %v4257_v13  ;;  %v4248_v1 = vsel %vm4246_vm14, %v4247_v52, %v4245_v15 }
 0x2ed   : > { %v4252_v0 = vsel %vm4251_vm5, %v4211_v35, %v4250_v5  ;;  %v4262_v9 = vsel %vm4260_vm2, %v4261_v55, %v4259_v21  ;;  %v4270_v18 = vpack.c.bf16 %v4248_v1, %v4220_v56 }
 0x2ee   : > { %v4255_v7 = vsel %vm4253_vm6, %v4254_v49, %v4252_v0  ;;  %v4266_v8 = vsel %vm4265_vm9, %v4213_v63, %v4264_v38  ;;  %v4272_v19 = vpack.c.bf16 %v4262_v9, %v4234_v12 }
 0x2ef   : > { %v4271_v10 = vpack.c.bf16 %v4255_v7, %v4227_v6  ;;  %v4269_v34 = vsel %vm4267_vm10, %v4268_v40, %v4266_v8 }
 0x2f0   : > { %v4273_v16 = vpack.c.bf16 %v4269_v34, %v4241_v14 }
 0x2f1   : > { %4562 = vmatprep.mubr.bf16.mxu0 %v4271_v10 }
 0x2f2   : > { %4603 = vmatprep.mubr.bf16.mxu1 %v4273_v16  ;;  %4563 = vmatmul.mubr.bf16.vlgmr.msra.gmra.mxu0 %v4270_v18 }
 0x2f3   : > { %4604 = vmatmul.mubr.bf16.vlgmr.msra.gmra.mxu1 %v4272_v19 }
 0x3b2   : > { %v5311_v20 = vpop.f32.mrf.mxu0 }
 0x3b3   : > { %v5333_v22 = vpop.f32.mrf.mxu1 }
 0x3b4   : > { %v5312_v23 = vpop.f32.mrf.mxu0 }
 0x3b5   : > { %v5313_v24 = vadd.f32 %v5312_v23, %v5311_v20  ;;  %v5334_v25 = vpop.f32.mrf.mxu1 }
 0x3b6   : > { %v5335_v26 = vadd.f32 %v5334_v25, %v5333_v22  ;;  %v5314_v27 = vpop.f32.mrf.mxu0 }
 0x3b7   : > { %v5336_v11 = vpop.f32.mrf.mxu1 }
 0x3b8   : > { %v4606_v29 = vadd.f32 %v5335_v26, %v5313_v24  ;;  %v5315_v30 = vpop.f32.mrf.mxu0 }
 0x3b9   : > { %v5316_v59 = vadd.f32 %v5315_v30, %v5314_v27  ;;  %v5337_v31 = vpop.f32.mrf.mxu1 }
 0x3ba   : > { %v4612_v28 = vmax.f32 %v4606_v29, 1e-07  ;;  %v5338_v57 = vadd.f32 %v5337_v31, %v5336_v11 }
 0x3bc   : > { %5419 = vlog2.f32 %v4612_v28  ;;  %v4609_v32 = vadd.f32 %v5338_v57, %v5316_v59 }
 0x3be   : > { %v4613_v60 = vmax.f32 %v4609_v32, 1e-07 }
 0x3c0   : > { %5421 = vlog2.f32 %v4613_v60 }
 0x3c9   : > { %v5420_v33 = vpop.eup %5419 }
 0x3ca   : > { %v4615_v62 = vmul.f32 0.6931472, %v5420_v33 }
 0x3cc   : > { %4618 = vst [vmem:[%s311_s8] sm:$0xff] %v4615_v62 }
 0x3cd   : > { %v5422_v35 = vpop.eup %5421 }
 0x3ce   : > { %v4617_v63 = vmul.f32 0.6931472, %v5422_v35 }
 0x3d0   : > { %4619 = vst [vmem:[%s311_s8 + $0x8] sm:$0xff] %v4617_v63 }
 0x3d1 PF: > { %s14_s17 = sadd.s32 1, %s5447_s17   ;;  %s7320_s15 = smov %s5443_s16 }
 0x3d2   : > { %p11_p5 = scmp.ge.s32.totalorder %s14_s17, 4   ;;  %s7321_s16 = smov %s7323_s18 }
 0x3d4   :  { %13 = sbr.rel (!%p11_p5) target bundleno = 2 (0x2), region = 69 }

</bundles_post_ra>
